<compile_context>
chip_gen: v6e
topology: v6e:2x2x1
jax: 0.10.0
libtpu: 0.0.40
codegen_flags: <defaults>
</compile_context>

<pallas_src>
import functools

import jax
import jax.numpy as jnp
from jax.experimental import pallas as pl
from jax.experimental.pallas import tpu as pltpu


def actor_kernel(adj_ref, dinv_ref, x_ref,
                 w1_ref, b1_ref,
                 wg1_ref, bg1_ref,
                 wg2_ref, bg2_ref,
                 w2_ref, b2_ref,
                 w3_ref, b3_ref,
                 out_ref):
    """One grid step = GB graphs stacked into M = GB*N rows, all tiles VMEM-resident.

    adj_ref : [M, M]       bf16 block-diagonal (A + I), exact 0/1 entries (shared graph)
    dinv_ref: [M, 1]       f32 precomputed D^-1/2 row scales
    x_ref   : [M, F_PAD]   bf16 node features (zero-padded lanes)
    w*      : bf16 weights stored [in, out];   b* : f32 biases [1, out]
    out_ref : [M, OUT_PAD] f32 softmax probabilities (lanes >= output_size are 0)
    """
    f32 = jnp.float32
    bf16 = jnp.bfloat16

    d_inv_sqrt = dinv_ref[...]                                    # [M, 1] f32, tiny

    def gcn(h, wg_ref, bg_ref):
        # relu( D^-1/2 (A+I) D^-1/2 (h @ W) + b ), D^-1/2 applied as cheap VPU row scales.
        hw = jnp.dot(h, wg_ref[...], preferred_element_type=f32)  # [M, H] f32
        hw = hw * d_inv_sqrt
        # Read adjacency at the use site (not held live across the whole body).
        agg = jnp.dot(adj_ref[...], hw.astype(bf16), preferred_element_type=f32)
        return jnp.maximum(agg * d_inv_sqrt + bg_ref[...], 0.0).astype(bf16)

    # fc1 + ReLU  (x already bf16, lane-padded; pad lanes of x / pad rows of w1 are zero)
    h = jnp.dot(x_ref[...], w1_ref[...], preferred_element_type=f32) + b1_ref[...]
    h = jnp.maximum(h, 0.0).astype(bf16)

    # two GCN layers
    h = gcn(h, wg1_ref, bg1_ref)
    h = gcn(h, wg2_ref, bg2_ref)

    # fc2 + ReLU
    h = jnp.dot(h, w2_ref[...], preferred_element_type=f32) + b2_ref[...]
    h = jnp.maximum(h, 0.0).astype(bf16)

    # fc3 + softmax over the (lane-padded) action axis.  Padded columns carry a huge
    # negative f32 bias so exp() underflows to exactly 0 and the real lanes equal the
    # softmax over the true output_size columns.
    logits = jnp.dot(h, w3_ref[...], preferred_element_type=f32) + b3_ref[...]
    m = jnp.max(logits, axis=1, keepdims=True)
    e = jnp.exp(logits - m)
    denom = jnp.sum(e, axis=1, keepdims=True)
    out_ref[...] = e * pl.reciprocal(denom)        # exact reciprocal: rows sum to 1


def _dense_self_loop_adjacency(edge_index, num_nodes):
    """Unnormalized A + I with PyG conventions (rows = message targets)."""
    src, dst = edge_index[0], edge_index[1]
    a = jnp.zeros((num_nodes, num_nodes), jnp.float32).at[dst, src].add(1.0)
    return a + jnp.eye(num_nodes, dtype=jnp.float32)


def actor_network_forward(x, edge_index, params, *, graphs_per_block=16):
    """x: [G, N, input_size] node features for G graphs sharing one static edge_index.

    graphs_per_block: 16 -> M = 256 rows/step (v6e/v7x 256-wide MXU); use 8 on v5e.
    """
    G, N, F = x.shape
    H = params["w1"].shape[1]
    OUT = params["w3"].shape[1]
    OUT_PAD = max(128, ((OUT + 127) // 128) * 128)   # lane-dense output store
    F_PAD = max(128, ((F + 127) // 128) * 128)       # lane-dense x DMA / fc1 LHS loads

    GB = graphs_per_block
    M = GB * N                                       # rows per grid step
    NB = pl.cdiv(G, GB)                              # grid size (keep even for v7x)
    G_pad = NB * GB

    # --- one-time graph prep (outside the kernel hot path; static topology) ---
    a_plus_i = _dense_self_loop_adjacency(edge_index, N)            # [N, N], exact ints
    deg = a_plus_i.sum(axis=1, keepdims=True)                       # [N, 1]
    d_inv_sqrt_n = jnp.where(deg > 0.0, 1.0 / jnp.sqrt(deg), 0.0)   # [N, 1] f32
    d_inv_sqrt = jnp.tile(d_inv_sqrt_n, (GB, 1))                    # [M, 1] f32
    adj_bd = jnp.kron(jnp.eye(GB, dtype=jnp.float32), a_plus_i)     # block-diag [M, M]
    adj_bd = adj_bd.astype(jnp.bfloat16)                            # 0/1 entries -> exact

    xp = x
    if G_pad != G:
        xp = jnp.concatenate([x, jnp.zeros((G_pad - G, N, F), x.dtype)], axis=0)
    x2d = xp.reshape(G_pad * N, F)
    x2d = jnp.zeros((G_pad * N, F_PAD), jnp.float32).at[:, :F].set(x2d).astype(jnp.bfloat16)

    # bf16 MXU operands, f32 biases; w1 row-padded to F_PAD, fc3 padded to OUT_PAD lanes.
    w1 = jnp.zeros((F_PAD, H), jnp.float32).at[:F, :].set(params["w1"]).astype(jnp.bfloat16)
    wg1 = params["wg1"].astype(jnp.bfloat16)
    wg2 = params["wg2"].astype(jnp.bfloat16)
    w2 = params["w2"].astype(jnp.bfloat16)
    w3 = jnp.zeros((H, OUT_PAD), jnp.float32).at[:, :OUT].set(params["w3"]).astype(jnp.bfloat16)
    b3 = jnp.full((1, OUT_PAD), -1e30, jnp.float32).at[:, :OUT].set(params["b3"])  # keep f32

    args = (adj_bd, d_inv_sqrt, x2d,
            w1, params["b1"],
            wg1, params["bg1"],
            wg2, params["bg2"],
            w2, params["b2"],
            w3, b3)

    def full(a):  # full-array block, grid-invariant (DMA'd once)
        nd = a.ndim
        return pl.BlockSpec(a.shape, lambda g: (0,) * nd)

    in_specs = [
        full(adj_bd),                                   # shared block-diag adjacency
        full(d_inv_sqrt),                               # precomputed D^-1/2 row scales
        pl.BlockSpec((M, F_PAD), lambda g: (g, 0)),     # this block's node features
        full(w1), full(params["b1"]),
        full(wg1), full(params["bg1"]),
        full(wg2), full(params["bg2"]),
        full(w2), full(params["b2"]),
        full(w3), full(b3),
    ]

    flops = 2 * NB * M * (F_PAD * H + 2 * (H * H + M * H) + H * H + H * OUT_PAD)
    transcendentals = NB * (M * OUT_PAD + M)
    bytes_accessed = int(sum(a.size * a.dtype.itemsize for a in args)
                         + NB * M * OUT_PAD * 4)

    out2d = pl.pallas_call(
        actor_kernel,
        out_shape=jax.ShapeDtypeStruct((NB * M, OUT_PAD), jnp.float32),
        grid=(NB,),
        in_specs=in_specs,
        out_specs=pl.BlockSpec((M, OUT_PAD), lambda g: (g, 0)),
        compiler_params=pltpu.CompilerParams(
            dimension_semantics=("parallel",)),
        cost_estimate=pl.CostEstimate(
            flops=flops,
            transcendentals=transcendentals,
            bytes_accessed=bytes_accessed),
    )(*args)

    # Un-pad: rows are graph-major/node-major; lanes >= OUT are exact zeros.
    return out2d[: G * N, :OUT].reshape(G, N, OUT)


def actor_reference(x, edge_index, params):
    """Pure-JAX f32 reference matching the PyTorch module (per-graph, vmapped)."""
    N = x.shape[1]
    a = _dense_self_loop_adjacency(edge_index, N)
    deg = a.sum(axis=1)
    d = jnp.where(deg > 0, 1.0 / jnp.sqrt(deg), 0.0)
    a_hat = d[:, None] * a * d[None, :]

    def one(xg):
        h = jax.nn.relu(xg @ params["w1"] + params["b1"])
        h = jax.nn.relu(a_hat @ (h @ params["wg1"]) + params["bg1"])
        h = jax.nn.relu(a_hat @ (h @ params["wg2"]) + params["bg2"])
        h = jax.nn.relu(h @ params["w2"] + params["b2"])
        return jax.nn.softmax(h @ params["w3"] + params["b3"], axis=1)

    return jax.vmap(one)(x)


def init_params(key, input_size, hidden_size, output_size):
    """Deterministic synthetic parameters (PyTorch shapes, stored transposed, f32)."""
    ks = jax.random.split(key, 6)

    def lin(k, fan_in, fan_out):
        bound = 1.0 / jnp.sqrt(fan_in)
        kw, kb = jax.random.split(k)
        w = jax.random.uniform(kw, (fan_in, fan_out), jnp.float32, -bound, bound)
        b = jax.random.uniform(kb, (1, fan_out), jnp.float32, -bound, bound)
        return w, b

    w1, b1 = lin(ks[0], input_size, hidden_size)
    wg1, bg1 = lin(ks[1], hidden_size, hidden_size)
    wg2, bg2 = lin(ks[2], hidden_size, hidden_size)
    w2, b2 = lin(ks[3], hidden_size, hidden_size)
    w3, b3 = lin(ks[4], hidden_size, output_size)
    return dict(w1=w1, b1=b1, wg1=wg1, bg1=bg1, wg2=wg2, bg2=bg2,
                w2=w2, b2=b2, w3=w3, b3=b3)


if __name__ == "__main__":
    key = jax.random.PRNGKey(0)
    k_x, k_p = jax.random.split(key)

    # 64 graphs x 16 nodes, input_size=8, hidden=128 (lane multiple), output_size=4.
    G, N, INPUT_SIZE, HIDDEN, OUTPUT_SIZE = 64, 16, 8, 128, 4
    GB = 16   # graphs per grid step -> M = GB*N = 256 rows (256-wide MXU); use 8 on v5e.

    x = jax.random.normal(k_x, (G, N, INPUT_SIZE), jnp.float32)

    # Deterministic bidirectional ring graph shared by every graph in the batch.
    idx = jnp.arange(N)
    src = jnp.concatenate([idx, (idx + 1) % N])
    dst = jnp.concatenate([(idx + 1) % N, idx])
    edge_index = jnp.stack([src, dst], axis=0)

    params = init_params(k_p, INPUT_SIZE, HIDDEN, OUTPUT_SIZE)

    fwd = jax.jit(functools.partial(actor_network_forward, graphs_per_block=GB))
    out = jax.block_until_ready(fwd(x, edge_index, params))

    assert out.shape == (G, N, OUTPUT_SIZE)
    # Softmax rows sum to 1 (exact reciprocal).
    assert bool(jnp.allclose(out.sum(axis=-1), 1.0, atol=1e-3))
    # Match the f32 pure-JAX reference (bf16 MXU operands / activations, f32 accumulation).
    ref = actor_reference(x, edge_index, params)
    assert bool(jnp.allclose(out, ref, atol=5e-2))
    print("KERNEL_OK")
</pallas_src>

<mosaic_0001>
module attributes {stable_mosaic.version = 11 : i64} {
  func.func private @main(%arg0: i32) attributes {dimension_semantics = [#tpu.dimension_semantics<core_parallel>], iteration_bounds = array<i64: 2>, tpu.core_type = #tpu.core_type<sc_scalar_subcore>, window_params = []} {
    return
  }
}

module attributes {stable_mosaic.version = 11 : i64} {
  func.func private @main(%arg0: i32) attributes {dimension_semantics = [#tpu.dimension_semantics<core_parallel>], iteration_bounds = array<i64: 2>, tpu.core_type = #tpu.core_type<sc_scalar_subcore>, window_params = []} {
    return
  }
}

module attributes {stable_mosaic.version = 11 : i64} {
  func.func @actor_kernel(%arg0: i32, %arg1: memref<256x256xbf16, #tpu.memory_space<vmem>>, %arg2: memref<256x1xf32, #tpu.memory_space<vmem>>, %arg3: memref<256x128xbf16, #tpu.memory_space<vmem>>, %arg4: memref<128x128xbf16, #tpu.memory_space<vmem>>, %arg5: memref<1x128xf32, #tpu.memory_space<vmem>>, %arg6: memref<128x128xbf16, #tpu.memory_space<vmem>>, %arg7: memref<1x128xf32, #tpu.memory_space<vmem>>, %arg8: memref<128x128xbf16, #tpu.memory_space<vmem>>, %arg9: memref<1x128xf32, #tpu.memory_space<vmem>>, %arg10: memref<128x128xbf16, #tpu.memory_space<vmem>>, %arg11: memref<1x128xf32, #tpu.memory_space<vmem>>, %arg12: memref<128x128xbf16, #tpu.memory_space<vmem>>, %arg13: memref<1x128xf32, #tpu.memory_space<vmem>>, %arg14: memref<256x128xf32, #tpu.memory_space<vmem>>) attributes {dimension_semantics = [#tpu.dimension_semantics<parallel>], iteration_bounds = array<i64: 4>, scalar_prefetch = 0 : i64, scratch_operands = 0 : i64, tpu.core_type = #tpu.core_type<tc>, window_params = [{pipeline_mode = #tpu.pipeline_mode<synchronous>, transform_indices = @transform_0, window_bounds = array<i64: 256, 256>}, {pipeline_mode = #tpu.pipeline_mode<synchronous>, transform_indices = @transform_1, window_bounds = array<i64: 256, 1>}, {transform_indices = @transform_2, window_bounds = array<i64: 256, 128>}, {pipeline_mode = #tpu.pipeline_mode<synchronous>, transform_indices = @transform_3, window_bounds = array<i64: 128, 128>}, {pipeline_mode = #tpu.pipeline_mode<synchronous>, transform_indices = @transform_4, window_bounds = array<i64: 1, 128>}, {pipeline_mode = #tpu.pipeline_mode<synchronous>, transform_indices = @transform_5, window_bounds = array<i64: 128, 128>}, {pipeline_mode = #tpu.pipeline_mode<synchronous>, transform_indices = @transform_6, window_bounds = array<i64: 1, 128>}, {pipeline_mode = #tpu.pipeline_mode<synchronous>, transform_indices = @transform_7, window_bounds = array<i64: 128, 128>}, {pipeline_mode = #tpu.pipeline_mode<synchronous>, transform_indices = @transform_8, window_bounds = array<i64: 1, 128>}, {pipeline_mode = #tpu.pipeline_mode<synchronous>, transform_indices = @transform_9, window_bounds = array<i64: 128, 128>}, {pipeline_mode = #tpu.pipeline_mode<synchronous>, transform_indices = @transform_10, window_bounds = array<i64: 1, 128>}, {pipeline_mode = #tpu.pipeline_mode<synchronous>, transform_indices = @transform_11, window_bounds = array<i64: 128, 128>}, {pipeline_mode = #tpu.pipeline_mode<synchronous>, transform_indices = @transform_12, window_bounds = array<i64: 1, 128>}, {transform_indices = @transform_13, window_bounds = array<i64: 256, 128>}]} {
    %c0 = arith.constant 0 : index
    %c0_0 = arith.constant 0 : index
    %0 = vector.load %arg2[%c0, %c0_0] : memref<256x1xf32, #tpu.memory_space<vmem>>, vector<256x1xf32>
    %c0_1 = arith.constant 0 : index
    %c0_2 = arith.constant 0 : index
    %1 = vector.load %arg3[%c0_1, %c0_2] : memref<256x128xbf16, #tpu.memory_space<vmem>>, vector<256x128xbf16>
    %c0_3 = arith.constant 0 : index
    %c0_4 = arith.constant 0 : index
    %2 = vector.load %arg4[%c0_3, %c0_4] : memref<128x128xbf16, #tpu.memory_space<vmem>>, vector<128x128xbf16>
    %cst = arith.constant dense<0.000000e+00> : vector<256x128xf32>
    %3 = tpu.matmul %1, %2, %cst {dimension_numbers = #tpu.dot_dimension_numbers<[1], [0], [0], [1], [0, 0, 1, 1], [], []>} : vector<256x128xbf16>, vector<128x128xbf16>, vector<256x128xf32> -> vector<256x128xf32>
    %c0_5 = arith.constant 0 : index
    %c0_6 = arith.constant 0 : index
    %4 = vector.load %arg5[%c0_5, %c0_6] : memref<1x128xf32, #tpu.memory_space<vmem>>, vector<1x128xf32>
    %5 = vector.broadcast %4 : vector<1x128xf32> to vector<256x128xf32>
    %6 = arith.addf %3, %5 : vector<256x128xf32>
    %cst_7 = arith.constant 0.000000e+00 : f32
    %7 = vector.broadcast %cst_7 : f32 to vector<256x128xf32>
    %8 = arith.maximumf %6, %7 : vector<256x128xf32>
    %9 = arith.truncf %8 : vector<256x128xf32> to vector<256x128xbf16>
    %c0_8 = arith.constant 0 : index
    %c0_9 = arith.constant 0 : index
    %10 = vector.load %arg6[%c0_8, %c0_9] : memref<128x128xbf16, #tpu.memory_space<vmem>>, vector<128x128xbf16>
    %cst_10 = arith.constant dense<0.000000e+00> : vector<256x128xf32>
    %11 = tpu.matmul %9, %10, %cst_10 {dimension_numbers = #tpu.dot_dimension_numbers<[1], [0], [0], [1], [0, 0, 1, 1], [], []>} : vector<256x128xbf16>, vector<128x128xbf16>, vector<256x128xf32> -> vector<256x128xf32>
    %12 = vector.broadcast %0 : vector<256x1xf32> to vector<256x128xf32>
    %13 = arith.mulf %11, %12 : vector<256x128xf32>
    %c0_11 = arith.constant 0 : index
    %c0_12 = arith.constant 0 : index
    %14 = vector.load %arg1[%c0_11, %c0_12] : memref<256x256xbf16, #tpu.memory_space<vmem>>, vector<256x256xbf16>
    %15 = arith.truncf %13 : vector<256x128xf32> to vector<256x128xbf16>
    %cst_13 = arith.constant dense<0.000000e+00> : vector<256x128xf32>
    %16 = tpu.matmul %14, %15, %cst_13 {dimension_numbers = #tpu.dot_dimension_numbers<[1], [0], [0], [1], [0, 0, 1, 1], [], []>} : vector<256x256xbf16>, vector<256x128xbf16>, vector<256x128xf32> -> vector<256x128xf32>
    %17 = vector.broadcast %0 : vector<256x1xf32> to vector<256x128xf32>
    %18 = arith.mulf %16, %17 : vector<256x128xf32>
    %c0_14 = arith.constant 0 : index
    %c0_15 = arith.constant 0 : index
    %19 = vector.load %arg7[%c0_14, %c0_15] : memref<1x128xf32, #tpu.memory_space<vmem>>, vector<1x128xf32>
    %20 = vector.broadcast %19 : vector<1x128xf32> to vector<256x128xf32>
    %21 = arith.addf %18, %20 : vector<256x128xf32>
    %cst_16 = arith.constant 0.000000e+00 : f32
    %22 = vector.broadcast %cst_16 : f32 to vector<256x128xf32>
    %23 = arith.maximumf %21, %22 : vector<256x128xf32>
    %24 = arith.truncf %23 : vector<256x128xf32> to vector<256x128xbf16>
    %c0_17 = arith.constant 0 : index
    %c0_18 = arith.constant 0 : index
    %25 = vector.load %arg8[%c0_17, %c0_18] : memref<128x128xbf16, #tpu.memory_space<vmem>>, vector<128x128xbf16>
    %cst_19 = arith.constant dense<0.000000e+00> : vector<256x128xf32>
    %26 = tpu.matmul %24, %25, %cst_19 {dimension_numbers = #tpu.dot_dimension_numbers<[1], [0], [0], [1], [0, 0, 1, 1], [], []>} : vector<256x128xbf16>, vector<128x128xbf16>, vector<256x128xf32> -> vector<256x128xf32>
    %27 = vector.broadcast %0 : vector<256x1xf32> to vector<256x128xf32>
    %28 = arith.mulf %26, %27 : vector<256x128xf32>
    %c0_20 = arith.constant 0 : index
    %c0_21 = arith.constant 0 : index
    %29 = vector.load %arg1[%c0_20, %c0_21] : memref<256x256xbf16, #tpu.memory_space<vmem>>, vector<256x256xbf16>
    %30 = arith.truncf %28 : vector<256x128xf32> to vector<256x128xbf16>
    %cst_22 = arith.constant dense<0.000000e+00> : vector<256x128xf32>
    %31 = tpu.matmul %29, %30, %cst_22 {dimension_numbers = #tpu.dot_dimension_numbers<[1], [0], [0], [1], [0, 0, 1, 1], [], []>} : vector<256x256xbf16>, vector<256x128xbf16>, vector<256x128xf32> -> vector<256x128xf32>
    %32 = vector.broadcast %0 : vector<256x1xf32> to vector<256x128xf32>
    %33 = arith.mulf %31, %32 : vector<256x128xf32>
    %c0_23 = arith.constant 0 : index
    %c0_24 = arith.constant 0 : index
    %34 = vector.load %arg9[%c0_23, %c0_24] : memref<1x128xf32, #tpu.memory_space<vmem>>, vector<1x128xf32>
    %35 = vector.broadcast %34 : vector<1x128xf32> to vector<256x128xf32>
    %36 = arith.addf %33, %35 : vector<256x128xf32>
    %cst_25 = arith.constant 0.000000e+00 : f32
    %37 = vector.broadcast %cst_25 : f32 to vector<256x128xf32>
    %38 = arith.maximumf %36, %37 : vector<256x128xf32>
    %39 = arith.truncf %38 : vector<256x128xf32> to vector<256x128xbf16>
    %c0_26 = arith.constant 0 : index
    %c0_27 = arith.constant 0 : index
    %40 = vector.load %arg10[%c0_26, %c0_27] : memref<128x128xbf16, #tpu.memory_space<vmem>>, vector<128x128xbf16>
    %cst_28 = arith.constant dense<0.000000e+00> : vector<256x128xf32>
    %41 = tpu.matmul %39, %40, %cst_28 {dimension_numbers = #tpu.dot_dimension_numbers<[1], [0], [0], [1], [0, 0, 1, 1], [], []>} : vector<256x128xbf16>, vector<128x128xbf16>, vector<256x128xf32> -> vector<256x128xf32>
    %c0_29 = arith.constant 0 : index
    %c0_30 = arith.constant 0 : index
    %42 = vector.load %arg11[%c0_29, %c0_30] : memref<1x128xf32, #tpu.memory_space<vmem>>, vector<1x128xf32>
    %43 = vector.broadcast %42 : vector<1x128xf32> to vector<256x128xf32>
    %44 = arith.addf %41, %43 : vector<256x128xf32>
    %cst_31 = arith.constant 0.000000e+00 : f32
    %45 = vector.broadcast %cst_31 : f32 to vector<256x128xf32>
    %46 = arith.maximumf %44, %45 : vector<256x128xf32>
    %47 = arith.truncf %46 : vector<256x128xf32> to vector<256x128xbf16>
    %c0_32 = arith.constant 0 : index
    %c0_33 = arith.constant 0 : index
    %48 = vector.load %arg12[%c0_32, %c0_33] : memref<128x128xbf16, #tpu.memory_space<vmem>>, vector<128x128xbf16>
    %cst_34 = arith.constant dense<0.000000e+00> : vector<256x128xf32>
    %49 = tpu.matmul %47, %48, %cst_34 {dimension_numbers = #tpu.dot_dimension_numbers<[1], [0], [0], [1], [0, 0, 1, 1], [], []>} : vector<256x128xbf16>, vector<128x128xbf16>, vector<256x128xf32> -> vector<256x128xf32>
    %c0_35 = arith.constant 0 : index
    %c0_36 = arith.constant 0 : index
    %50 = vector.load %arg13[%c0_35, %c0_36] : memref<1x128xf32, #tpu.memory_space<vmem>>, vector<1x128xf32>
    %51 = vector.broadcast %50 : vector<1x128xf32> to vector<256x128xf32>
    %52 = arith.addf %49, %51 : vector<256x128xf32>
    %cst_37 = arith.constant dense<0xFF800000> : vector<256xf32>
    %53 = vector.multi_reduction <maximumf>, %52, %cst_37 [1] : vector<256x128xf32> to vector<256xf32>
    %54 = vector.shape_cast %53 : vector<256xf32> to vector<256x1xf32>
    %55 = vector.broadcast %54 : vector<256x1xf32> to vector<256x128xf32>
    %56 = arith.subf %52, %55 : vector<256x128xf32>
    %57 = math.exp %56 : vector<256x128xf32>
    %cst_38 = arith.constant dense<0.000000e+00> : vector<256xf32>
    %58 = vector.multi_reduction <add>, %57, %cst_38 [1] : vector<256x128xf32> to vector<256xf32>
    %59 = vector.shape_cast %58 : vector<256xf32> to vector<256x1xf32>
    %60 = tpu.reciprocal %59 : vector<256x1xf32> -> vector<256x1xf32>
    %61 = vector.broadcast %60 : vector<256x1xf32> to vector<256x128xf32>
    %62 = arith.mulf %57, %61 : vector<256x128xf32>
    %c0_39 = arith.constant 0 : index
    %c0_40 = arith.constant 0 : index
    %63 = vector.load %arg14[%c0_39, %c0_40] : memref<256x128xf32, #tpu.memory_space<vmem>>, vector<256x128xf32>
    tpu.vector_store %arg14[%c0_39, %c0_40], %62 {strides = array<i32>} : memref<256x128xf32, #tpu.memory_space<vmem>>, vector<256x128xf32>,
    return
  }
  func.func @transform_0(%arg0: i32) -> (i32, i32) {
    %c0_i32 = arith.constant 0 : i32
    %c0_i32_0 = arith.constant 0 : i32
    %c0_i32_1 = arith.constant 0 : i32
    return %c0_i32, %c0_i32_0 : i32, i32
  }
  func.func @transform_1(%arg0: i32) -> (i32, i32) {
    %c0_i32 = arith.constant 0 : i32
    %c0_i32_0 = arith.constant 0 : i32
    %c0_i32_1 = arith.constant 0 : i32
    return %c0_i32, %c0_i32_0 : i32, i32
  }
  func.func @transform_2(%arg0: i32) -> (i32, i32) {
    %c0_i32 = arith.constant 0 : i32
    %c0_i32_0 = arith.constant 0 : i32
    return %arg0, %c0_i32 : i32, i32
  }
  func.func @transform_3(%arg0: i32) -> (i32, i32) {
    %c0_i32 = arith.constant 0 : i32
    %c0_i32_0 = arith.constant 0 : i32
    %c0_i32_1 = arith.constant 0 : i32
    return %c0_i32, %c0_i32_0 : i32, i32
  }
  func.func @transform_4(%arg0: i32) -> (i32, i32) {
    %c0_i32 = arith.constant 0 : i32
    %c0_i32_0 = arith.constant 0 : i32
    %c0_i32_1 = arith.constant 0 : i32
    return %c0_i32, %c0_i32_0 : i32, i32
  }
  func.func @transform_5(%arg0: i32) -> (i32, i32) {
    %c0_i32 = arith.constant 0 : i32
    %c0_i32_0 = arith.constant 0 : i32
    %c0_i32_1 = arith.constant 0 : i32
    return %c0_i32, %c0_i32_0 : i32, i32
  }
  func.func @transform_6(%arg0: i32) -> (i32, i32) {
    %c0_i32 = arith.constant 0 : i32
    %c0_i32_0 = arith.constant 0 : i32
    %c0_i32_1 = arith.constant 0 : i32
    return %c0_i32, %c0_i32_0 : i32, i32
  }
  func.func @transform_7(%arg0: i32) -> (i32, i32) {
    %c0_i32 = arith.constant 0 : i32
    %c0_i32_0 = arith.constant 0 : i32
    %c0_i32_1 = arith.constant 0 : i32
    return %c0_i32, %c0_i32_0 : i32, i32
  }
  func.func @transform_8(%arg0: i32) -> (i32, i32) {
    %c0_i32 = arith.constant 0 : i32
    %c0_i32_0 = arith.constant 0 : i32
    %c0_i32_1 = arith.constant 0 : i32
    return %c0_i32, %c0_i32_0 : i32, i32
  }
  func.func @transform_9(%arg0: i32) -> (i32, i32) {
    %c0_i32 = arith.constant 0 : i32
    %c0_i32_0 = arith.constant 0 : i32
    %c0_i32_1 = arith.constant 0 : i32
    return %c0_i32, %c0_i32_0 : i32, i32
  }
  func.func @transform_10(%arg0: i32) -> (i32, i32) {
    %c0_i32 = arith.constant 0 : i32
    %c0_i32_0 = arith.constant 0 : i32
    %c0_i32_1 = arith.constant 0 : i32
    return %c0_i32, %c0_i32_0 : i32, i32
  }
  func.func @transform_11(%arg0: i32) -> (i32, i32) {
    %c0_i32 = arith.constant 0 : i32
    %c0_i32_0 = arith.constant 0 : i32
    %c0_i32_1 = arith.constant 0 : i32
    return %c0_i32, %c0_i32_0 : i32, i32
  }
  func.func @transform_12(%arg0: i32) -> (i32, i32) {
    %c0_i32 = arith.constant 0 : i32
    %c0_i32_0 = arith.constant 0 : i32
    %c0_i32_1 = arith.constant 0 : i32
    return %c0_i32, %c0_i32_0 : i32, i32
  }
  func.func @transform_13(%arg0: i32) -> (i32, i32) {
    %c0_i32 = arith.constant 0 : i32
    %c0_i32_0 = arith.constant 0 : i32
    return %arg0, %c0_i32 : i32, i32
  }
}

</mosaic_0001>

<bundles_post_ra>
// kernel: actor_network_forward.1
= control target key start
LH: loop header
LB: loop body
LE: loop exit
PB: predicated region body
PF: predicated region fallthrough
CT: control target
= control target key end

     0   :  { %s4257_s25 = smov 0   ;;  %s5490_s0 = inlined_call_operand.vmem [shape: bf16[256,256], index: 0, kind: input, shape index: {}]   ;;  %s5491_s1 = inlined_call_operand.vmem [shape: f32[256,1], index: 1, kind: input, shape index: {}]   ;;  %s5492_s2 = inlined_call_operand.vmem [shape: bf16[1024,128], index: 2, kind: input, shape index: {}]   ;;  %s5493_s3 = inlined_call_operand.vmem [shape: bf16[128,128], index: 3, kind: input, shape index: {}]   ;;  %s5494_s4 = inlined_call_operand.vmem [shape: f32[1,128], index: 4, kind: input, shape index: {}]   ;;  %s5495_s5 = inlined_call_operand.vmem [shape: bf16[128,128], index: 5, kind: input, shape index: {}]   ;;  %s5496_s6 = inlined_call_operand.vmem [shape: f32[1,128], index: 6, kind: input, shape index: {}]   ;;  %s5497_s7 = inlined_call_operand.vmem [shape: bf16[128,128], index: 7, kind: input, shape index: {}]   ;;  %s5498_s8 = inlined_call_operand.vmem [shape: f32[1,128], index: 8, kind: input, shape index: {}]   ;;  %s5499_s9 = inlined_call_operand.vmem [shape: bf16[128,128], index: 9, kind: input, shape index: {}]   ;;  %s5500_s10 = inlined_call_operand.vmem [shape: f32[1,128], index: 10, kind: input, shape index: {}]   ;;  %s5501_s11 = inlined_call_operand.vmem [shape: bf16[128,128], index: 11, kind: input, shape index: {}]   ;;  %s5502_s12 = inlined_call_operand.vmem [shape: f32[1,128], index: 12, kind: input, shape index: {}]   ;;  %s5503_s13 = inlined_call_operand.vmem [shape: f32[1024,128], index: 13, kind: output, shape index: {}]  }
   0x1 LB: > { %s3231_s26 = sadd.s32 4294967295, %s4184_s25   ;;  %p3235_p0 = scmp.ge.s32.totalorder %s4184_s25, 1  ;;  %s4184_s25 = sphi %s4257_s25, %s23_s25  }
   0x2   : > { %p388_p1 = scmp.lt.s32.totalorder %s4184_s25, 5 }
   0x4   : > { %p389_p2 = pnand %p3235_p0, %p388_p1 }
   0x6   : > { %392 = sbr.rel (%p389_p2) target bundleno = 2153 (0x869), region = 72 }
   0xb   : > { %v3946_v0 = vld [vmem:[%s5493_s3 + $0x38] sm:$0xff]   ;;  %s3236_s29 = sshll.u32 %s3231_s26, 5  ;;  %v3947_v1 = vld [vmem:[%s5493_s3 + $0x30] sm:$0xff]   ;;  %v3948_v2 = vld [vmem:[%s5493_s3 + $0x28] sm:$0xff]   ;;  %v4186_v32 = vmov 0  }
   0xc   : > { %p433_p3 = scmp.lt.s32.totalorder %s3236_s29, 127  ;;  %3679 = vmatprep.subr.bf16.mxu0 %v3946_v0  ;;  %3919 = vmatprep.subr.bf16.mxu1 %v3946_v0  ;;  %v3949_v3 = vld [vmem:[%s5493_s3 + $0x20] sm:$0xff]   ;;  %v3950_v5 = vld [vmem:[%s5493_s3 + $0x18] sm:$0xff]   ;;  %v3951_v6 = vld [vmem:[%s5493_s3 + $0x10] sm:$0xff]  }
   0xd   : > { %3680 = vmatpush3.bf16.msra.mxu0 %v3946_v0  ;;  %3927 = vmatpush3.bf16.msra.mxu1 %v3946_v0  ;;  %v3952_v8 = vld [vmem:[%s5493_s3 + $0x8] sm:$0xff]   ;;  %v3953_v9 = vld [vmem:[%s5493_s3] sm:$0xff]   ;;  %v3970_v12 = vld [vmem:[%s5495_s5 + $0x38] sm:$0xff]  }
   0xe   : > { %s5660_s29 = smov (!%p433_p3, %s3236_s29), 127  ;;  %3681 = vmatprep.subr.bf16.mxu0 %v3947_v1  ;;  %3920 = vmatprep.subr.bf16.mxu1 %v3947_v1  ;;  %v3971_v15 = vld [vmem:[%s5495_s5 + $0x30] sm:$0xff]   ;;  %v3972_v16 = vld [vmem:[%s5495_s5 + $0x28] sm:$0xff]   ;;  %v3973_v21 = vld [vmem:[%s5495_s5 + $0x20] sm:$0xff]  }
   0xf   : > { %s3237_s17 = sshll.u32 %s5660_s29, 2  ;;  %v3974_v22 = vld [vmem:[%s5495_s5 + $0x18] sm:$0xff]   ;;  %v3975_v29 = vld [vmem:[%s5495_s5 + $0x10] sm:$0xff]   ;;  %v3976_v30 = vld [vmem:[%s5495_s5 + $0x8] sm:$0xff]   ;;  %3944 = vset.pattern.permute.xlu0 %v4186_v32  ;;  %3945 = vset.pattern.permute.xlu1 %v4186_v32  ;;  %s3239_s24 = sshll.u32 %s5660_s29, 3 }
  0x10   : > { %s4280_s20 = scalar_lea.vmem %s5492_s2, %s3237_s17  ;;  %v3977_v31 = vld [vmem:[%s5495_s5] sm:$0xff]   ;;  %v475_v33 = vld [vmem:[%s5491_s1 + $0xf0] sm:$0xff]  ;;  %v476_v34 = vld [vmem:[%s5491_s1 + $0xf8] sm:$0xff]  ;;  %s5421_s28 = scalar_lea.vmem %s5503_s13, %s3239_s24 }
  0x11   : > { %3682 = vmatpush3.bf16.msra.mxu0 %v3947_v1  ;;  %3928 = vmatpush3.bf16.msra.mxu1 %v3947_v1  ;;  %v3954_v4 = vld [vmem:[%s4280_s20] sm:$0xff]   ;;  %v3955_v10 = vld [vmem:[%s4280_s20 + $0x8] sm:$0xff]   ;;  %v3956_v13 = vld [vmem:[%s4280_s20 + $0x10] sm:$0xff]  }
  0x12   : > { %3683 = vmatprep.subr.bf16.mxu0 %v3948_v2  ;;  %3921 = vmatprep.subr.bf16.mxu1 %v3948_v2  ;;  %v3962_v7 = vld [vmem:[%s4280_s20 + $0x40] sm:$0xff]   ;;  %v3963_v11 = vld [vmem:[%s4280_s20 + $0x48] sm:$0xff]   ;;  %v3964_v14 = vld [vmem:[%s4280_s20 + $0x50] sm:$0xff]  }
  0x13   : > { %3695 = vmatprep.mubr.bf16.mxu0 %v3954_v4  ;;  %3711 = vmatprep.mubr.bf16.mxu1 %v3962_v7  ;;  %v3957_v17 = vld [vmem:[%s4280_s20 + $0x18] sm:$0xff]   ;;  %v3958_v19 = vld [vmem:[%s4280_s20 + $0x20] sm:$0xff]   ;;  %v3959_v23 = vld [vmem:[%s4280_s20 + $0x28] sm:$0xff]  }
  0x14   : > { %v3965_v18 = vld [vmem:[%s4280_s20 + $0x58] sm:$0xff]   ;;  %v3966_v20 = vld [vmem:[%s4280_s20 + $0x60] sm:$0xff]   ;;  %v3967_v24 = vld [vmem:[%s4280_s20 + $0x68] sm:$0xff]   ;;  %1262 = vperm.xlu0 %3944, %v475_v33  }
  0x15   : > { %3684 = vmatpush3.bf16.msra.mxu0 %v3948_v2  ;;  %3929 = vmatpush3.bf16.msra.mxu1 %v3948_v2  ;;  %v3960_v25 = vld [vmem:[%s4280_s20 + $0x30] sm:$0xff]   ;;  %v3961_v27 = vld [vmem:[%s4280_s20 + $0x38] sm:$0xff]   ;;  %v473_v36 = vld [vmem:[%s5491_s1 + $0xe0] sm:$0xff] }
  0x16   : > { %3685 = vmatprep.subr.bf16.mxu0 %v3949_v3  ;;  %3922 = vmatprep.subr.bf16.mxu1 %v3949_v3  ;;  %v3968_v26 = vld [vmem:[%s4280_s20 + $0x70] sm:$0xff]   ;;  %v3969_v28 = vld [vmem:[%s4280_s20 + $0x78] sm:$0xff]   ;;  %v474_v38 = vld [vmem:[%s5491_s1 + $0xe8] sm:$0xff] }
  0x17   : > { %v459_v35 = vld [vmem:[%s5491_s1 + $0x70] sm:$0xff]  ;;  %v460_v37 = vld [vmem:[%s5491_s1 + $0x78] sm:$0xff]  ;;  %v457_v39 = vld [vmem:[%s5491_s1 + $0x60] sm:$0xff] }
  0x18   : > { %1267 = vperm.xlu0 %3944, %v476_v34   ;;  %1182 = vperm.xlu1 %3945, %v459_v35   ;;  %v458_v40 = vld [vmem:[%s5491_s1 + $0x68] sm:$0xff]  ;;  %v471_v41 = vld [vmem:[%s5491_s1 + $0xd0] sm:$0xff]  ;;  %v472_v42 = vld [vmem:[%s5491_s1 + $0xd8] sm:$0xff] }
  0x19   : > { %3686 = vmatpush3.bf16.msra.mxu0 %v3949_v3  ;;  %3930 = vmatpush3.bf16.msra.mxu1 %v3949_v3  ;;  %v455_v43 = vld [vmem:[%s5491_s1 + $0x50] sm:$0xff]  ;;  %v456_v44 = vld [vmem:[%s5491_s1 + $0x58] sm:$0xff]  ;;  %v469_v45 = vld [vmem:[%s5491_s1 + $0xc0] sm:$0xff] }
  0x1a   : > { %3687 = vmatprep.subr.bf16.mxu0 %v3950_v5  ;;  %3923 = vmatprep.subr.bf16.mxu1 %v3950_v5  ;;  %v470_v46 = vld [vmem:[%s5491_s1 + $0xc8] sm:$0xff]  ;;  %v453_v47 = vld [vmem:[%s5491_s1 + $0x40] sm:$0xff]  ;;  %v467_v49 = vld [vmem:[%s5491_s1 + $0xb0] sm:$0xff] }
  0x1b   : > { %v454_v48 = vld [vmem:[%s5491_s1 + $0x48] sm:$0xff]  ;;  %v468_v50 = vld [vmem:[%s5491_s1 + $0xb8] sm:$0xff]  ;;  %v451_v51 = vld [vmem:[%s5491_s1 + $0x30] sm:$0xff] }
  0x1c   : > { %1252 = vperm.xlu0 %3944, %v473_v36   ;;  %1187 = vperm.xlu1 %3945, %v460_v37   ;;  %v452_v52 = vld [vmem:[%s5491_s1 + $0x38] sm:$0xff]  ;;  %v465_v53 = vld [vmem:[%s5491_s1 + $0xa0] sm:$0xff]  ;;  %v466_v54 = vld [vmem:[%s5491_s1 + $0xa8] sm:$0xff] }
  0x1d   : > { %3688 = vmatpush3.bf16.msra.mxu0 %v3950_v5  ;;  %3931 = vmatpush3.bf16.msra.mxu1 %v3950_v5  ;;  %v449_v55 = vld [vmem:[%s5491_s1 + $0x20] sm:$0xff]  ;;  %v450_v56 = vld [vmem:[%s5491_s1 + $0x28] sm:$0xff]  ;;  %v463_v57 = vld [vmem:[%s5491_s1 + $0x90] sm:$0xff] }
  0x1e   : > { %3689 = vmatprep.subr.bf16.mxu0 %v3951_v6  ;;  %3924 = vmatprep.subr.bf16.mxu1 %v3951_v6  ;;  %v464_v58 = vld [vmem:[%s5491_s1 + $0x98] sm:$0xff]  ;;  %v447_v59 = vld [vmem:[%s5491_s1 + $0x10] sm:$0xff]  ;;  %v461_v61 = vld [vmem:[%s5491_s1 + $0x80] sm:$0xff] }
  0x1f   : > { %v448_v60 = vld [vmem:[%s5491_s1 + $0x18] sm:$0xff]  ;;  %v462_v62 = vld [vmem:[%s5491_s1 + $0x88] sm:$0xff]  ;;  %v445_v63 = vld [vmem:[%s5491_s1] sm:$0xff] }
  0x20   : > { %1257 = vperm.xlu1 %3945, %v474_v38   ;;  %1172 = vperm.xlu0 %3944, %v457_v39   ;;  %v446_v0 = vld [vmem:[%s5491_s1 + $0x8] sm:$0xff]  ;;  %v4438_v5 = vld [vmem:[%s5494_s4] ss:$0 sm:$0xff] }
  0x21   : > { %3690 = vmatpush3.bf16.msra.mxu0 %v3951_v6  ;;  %3932 = vmatpush3.bf16.msra.mxu1 %v3951_v6 }
  0x22   : > { %3691 = vmatprep.subr.bf16.mxu0 %v3952_v8  ;;  %3925 = vmatprep.subr.bf16.mxu1 %v3952_v8 }
  0x24   : > { %1177 = vperm.xlu1 %3945, %v458_v40   ;;  %1242 = vperm.xlu0 %3944, %v471_v41  }
  0x25   : > { %3692 = vmatpush3.bf16.msra.mxu0 %v3952_v8  ;;  %3933 = vmatpush3.bf16.msra.mxu1 %v3952_v8 }
  0x26   : > { %3693 = vmatprep.subr.bf16.mxu0 %v3953_v9  ;;  %3926 = vmatprep.subr.bf16.mxu1 %v3953_v9 }
  0x28   : > { %1247 = vperm.xlu1 %3945, %v472_v42   ;;  %1162 = vperm.xlu0 %3944, %v455_v43  }
  0x29   : > { %3694 = vmatpush3.bf16.msra.mxu0 %v3953_v9  ;;  %3934 = vmatpush3.bf16.msra.mxu1 %v3953_v9 }
  0x2a   : > { %3727 = vmatprep.subr.bf16.mxu1 %v3970_v12 }
  0x2c   : > { %3696 = vmatmul.mubr.bf16.vlgmr.msra.gmra.mxu0 %v3955_v10  ;;  %3712 = vmatmul.mubr.bf16.vlgmr.msra.gmra.mxu1 %v3963_v11 }
  0x2d   : > { %3699 = vmatprep.mubr.bf16.mxu0 %v3956_v13  ;;  %3715 = vmatprep.mubr.bf16.mxu1 %v3964_v14 }
  0x2e   : > { %3728 = vmatpush3.bf16.msra.mxu1 %v3970_v12  ;;  %1167 = vperm.xlu1 %3945, %v456_v44  }
  0x2f   : > { %3729 = vmatprep.subr.bf16.mxu1 %v3971_v15  ;;  %1232 = vperm.xlu0 %3944, %v469_v45  }
  0x32   : > { %3730 = vmatpush3.bf16.msra.mxu1 %v3971_v15  ;;  %1237 = vperm.xlu1 %3945, %v470_v46  }
  0x33   : > { %3731 = vmatprep.subr.bf16.mxu1 %v3972_v16  ;;  %1152 = vperm.xlu0 %3944, %v453_v47  }
  0x34   : > { %3700 = vmatmul.mubr.bf16.gmra.mxu0 %v3957_v17  ;;  %3716 = vmatmul.mubr.bf16.gmra.mxu1 %v3965_v18 }
  0x35   : > { %3703 = vmatprep.mubr.bf16.mxu0 %v3958_v19  ;;  %3719 = vmatprep.mubr.bf16.mxu1 %v3966_v20 }
  0x36   : > { %3732 = vmatpush3.bf16.msra.mxu1 %v3972_v16  ;;  %1157 = vperm.xlu1 %3945, %v454_v48  }
  0x37   : > { %3733 = vmatprep.subr.bf16.mxu1 %v3973_v21  ;;  %1222 = vperm.xlu0 %3944, %v467_v49  }
  0x3a   : > { %3734 = vmatpush3.bf16.msra.mxu1 %v3973_v21  ;;  %1227 = vperm.xlu1 %3945, %v468_v50  }
  0x3b   : > { %3735 = vmatprep.subr.bf16.mxu1 %v3974_v22  ;;  %1142 = vperm.xlu0 %3944, %v451_v51  }
  0x3c   : > { %3704 = vmatmul.mubr.bf16.gmra.mxu0 %v3959_v23  ;;  %3720 = vmatmul.mubr.bf16.gmra.mxu1 %v3967_v24 }
  0x3d   : > { %3707 = vmatprep.mubr.bf16.mxu0 %v3960_v25  ;;  %3723 = vmatprep.mubr.bf16.mxu1 %v3968_v26 }
  0x3e   : > { %3736 = vmatpush3.bf16.msra.mxu1 %v3974_v22  ;;  %1147 = vperm.xlu1 %3945, %v452_v52  }
  0x3f   : > { %3737 = vmatprep.subr.bf16.mxu1 %v3975_v29  ;;  %1212 = vperm.xlu0 %3944, %v465_v53  }
  0x42   : > { %3738 = vmatpush3.bf16.msra.mxu1 %v3975_v29  ;;  %1217 = vperm.xlu1 %3945, %v466_v54  }
  0x43   : > { %3739 = vmatprep.subr.bf16.mxu1 %v3976_v30  ;;  %1132 = vperm.xlu0 %3944, %v449_v55  }
  0x44   : > { %3708 = vmatmul.mubr.bf16.gmra.mxu0 %v3961_v27  ;;  %3724 = vmatmul.mubr.bf16.gmra.mxu1 %v3969_v28 }
  0x46   : > { %3740 = vmatpush3.bf16.msra.mxu1 %v3976_v30  ;;  %1137 = vperm.xlu1 %3945, %v450_v56  }
  0x47   : > { %3741 = vmatprep.subr.bf16.mxu1 %v3977_v31  ;;  %1202 = vperm.xlu0 %3944, %v463_v57  }
  0x4a   : > { %3742 = vmatpush3.bf16.msra.mxu1 %v3977_v31  ;;  %1207 = vperm.xlu1 %3945, %v464_v58  }
  0x4b   : > { %1122 = vperm.xlu0 %3944, %v447_v59  }
  0x4e   : > { %1127 = vperm.xlu1 %3945, %v448_v60  }
  0x4f   : > { %1192 = vperm.xlu0 %3944, %v461_v61  }
  0x52   : > { %1197 = vperm.xlu1 %3945, %v462_v62  }
  0x53   : > { %1112 = vperm.xlu0 %3944, %v445_v63  }
  0x56   : > { %1117 = vperm.xlu1 %3945, %v446_v0  }
  0xec   : > { %v3697_v1 = vpop.f32.mrf.mxu0  ;;  %v4433_v2 = vpop.f32.mrf.mxu1 }
  0xed   : > { %v719_v10 = vadd.f32 %v3697_v1, %v4438_v5 }
  0xee   : > { %v710_v3 = vpop.f32.mrf.mxu0  ;;  %v774_v4 = vpop.f32.mrf.mxu1 }
  0xef   : > { %v711_v8 = vadd.f32 %v4438_v5, %v710_v3  ;;  %v839_v19 = vmax.f32 %v719_v10, 0.0  ;;  %v775_v54 = vadd.f32 %v4438_v5, %v774_v4 }
  0xf0   : > { %v3698_v6 = vpop.f32.mrf.mxu0  ;;  %v4440_v7 = vpop.f32.mrf.mxu1 }
  0xf1   : > { %v722_v9 = vadd.f32 %v3698_v6, %v4438_v5  ;;  %v837_v17 = vmax.f32 %v711_v8, 0.0  ;;  %v853_v0 = vmax.f32 %v775_v54, 0.0 }
  0xf2   : > { %v713_v11 = vpop.f32.mrf.mxu0  ;;  %v777_v12 = vpop.f32.mrf.mxu1 }
  0xf3   : > { %v714_v13 = vadd.f32 %v4438_v5, %v713_v11  ;;  %v840_v14 = vmax.f32 %v722_v9, 0.0  ;;  %v778_v56 = vadd.f32 %v4438_v5, %v777_v12 }
  0xf4   : > { %v3701_v15 = vpop.f32.mrf.mxu0  ;;  %v4446_v16 = vpop.f32.mrf.mxu1 }
  0xf5   : > { %v838_v18 = vmax.f32 %v714_v13, 0.0  ;;  %v870_v23 = vpack.c.bf16 %v840_v14, %v839_v19  ;;  %v735_v28 = vadd.f32 %v3701_v15, %v4438_v5  ;;  %v854_v3 = vmax.f32 %v778_v56, 0.0 }
  0xf6   : > { %v726_v20 = vpop.f32.mrf.mxu0  ;;  %v790_v21 = vpop.f32.mrf.mxu1  ;;  %v783_v15 = vadd.f32 %v4433_v2, %v4438_v5  ;;  %v799_v2 = vadd.f32 %v4446_v16, %v4438_v5 }
  0xf7   : > { %v869_v22 = vpack.c.bf16 %v838_v18, %v837_v17  ;;  %v727_v26 = vadd.f32 %v4438_v5, %v726_v20  ;;  %v843_v36 = vmax.f32 %v735_v28, 0.0  ;;  %v791_v11 = vadd.f32 %v4438_v5, %v790_v21 }
  0xf8   : > { %v3702_v24 = vpop.f32.mrf.mxu0  ;;  %v4448_v25 = vpop.f32.mrf.mxu1  ;;  %v877_v13 = vpack.c.bf16 %v854_v3, %v853_v0  ;;  %v786_v18 = vadd.f32 %v4440_v7, %v4438_v5  ;;  %v4516_v0 = vld [vmem:[%s5490_s0 + $0x4] ss:$8 sps:$4 sm:$0xff]  }
  0xf9   : > { %v738_v27 = vadd.f32 %v3702_v24, %v4438_v5  ;;  %3743 = vmatprep.mubr.bf16.mxu1 %v869_v22  ;;  %v841_v34 = vmax.f32 %v727_v26, 0.0  ;;  %v857_v20 = vmax.f32 %v791_v11, 0.0  ;;  %v802_v7 = vadd.f32 %v4448_v25, %v4438_v5  ;;  %5557 = vst [vmem:[#allocation2_spill] sm:$0xff] %v4516_v0  ;;  %1542 = vmatprep.mubr.bf16.mxu0 %v4516_v0 }
  0xfa   : > { %v729_v29 = vpop.f32.mrf.mxu0  ;;  %3744 = vmatmul.mubr.bf16.vlgmr.msra.gmra.mxu1 %v870_v23  ;;  %v793_v33 = vpop.f32.mrf.mxu1  ;;  %v855_v23 = vmax.f32 %v783_v15, 0.0  ;;  %v856_v24 = vmax.f32 %v786_v18, 0.0 }
  0xfb   : > { %v730_v30 = vadd.f32 %v4438_v5, %v729_v29  ;;  %v844_v31 = vmax.f32 %v738_v27, 0.0  ;;  %v794_v14 = vadd.f32 %v4438_v5, %v793_v33  ;;  %v859_v33 = vmax.f32 %v799_v2, 0.0 }
  0xfc   : > { %v3705_v32 = vpop.f32.mrf.mxu0  ;;  %v4454_v41 = vpop.f32.mrf.mxu1  ;;  %v878_v29 = vpack.c.bf16 %v856_v24, %v855_v23 }
  0xfd   : > { %v842_v35 = vmax.f32 %v730_v30, 0.0  ;;  %v872_v39 = vpack.c.bf16 %v844_v31, %v843_v36  ;;  %v751_v44 = vadd.f32 %v3705_v32, %v4438_v5  ;;  %v858_v22 = vmax.f32 %v794_v14, 0.0 }
  0xfe   : > { %v742_v37 = vpop.f32.mrf.mxu0  ;;  %v806_v49 = vpop.f32.mrf.mxu1  ;;  %v815_v16 = vadd.f32 %v4454_v41, %v4438_v5 }
  0xff   : > { %v871_v38 = vpack.c.bf16 %v842_v35, %v841_v34  ;;  %v743_v42 = vadd.f32 %v4438_v5, %v742_v37  ;;  %v847_v52 = vmax.f32 %v751_v44, 0.0  ;;  %v807_v26 = vadd.f32 %v4438_v5, %v806_v49  ;;  %v4485_v41 = vpop.permute.xlu0 %1262 }
 0x100   : > { %v3706_v40 = vpop.f32.mrf.mxu0  ;;  %v3722_v59 = vpop.f32.mrf.mxu1  ;;  %v879_v27 = vpack.c.bf16 %v858_v22, %v857_v20  ;;  %v860_v34 = vmax.f32 %v802_v7, 0.0 }
 0x101   : > { %v754_v43 = vadd.f32 %v3706_v40, %v4438_v5  ;;  %3747 = vmatprep.mubr.bf16.mxu1 %v871_v38  ;;  %v845_v50 = vmax.f32 %v743_v42, 0.0  ;;  %v861_v31 = vmax.f32 %v807_v26, 0.0  ;;  %v818_v40 = vadd.f32 %v3722_v59, %v4438_v5 }
 0x102   : > { %v745_v45 = vpop.f32.mrf.mxu0  ;;  %3748 = vmatmul.mubr.bf16.gmra.mxu1 %v872_v39  ;;  %v809_v6 = vpop.f32.mrf.mxu1  ;;  %v880_v39 = vpack.c.bf16 %v860_v34, %v859_v33 }
 0x103   : > { %v746_v46 = vadd.f32 %v4438_v5, %v745_v45  ;;  %v848_v47 = vmax.f32 %v754_v43, 0.0  ;;  %v810_v28 = vadd.f32 %v4438_v5, %v809_v6  ;;  %v863_v43 = vmax.f32 %v815_v16, 0.0 }
 0x104   : > { %v3709_v48 = vpop.f32.mrf.mxu0  ;;  %v3725_v19 = vpop.f32.mrf.mxu1  ;;  %v864_v44 = vmax.f32 %v818_v40, 0.0 }
 0x105   : > { %v846_v51 = vmax.f32 %v746_v46, 0.0  ;;  %v874_v57 = vpack.c.bf16 %v848_v47, %v847_v52  ;;  %v767_v62 = vadd.f32 %v3709_v48, %v4438_v5  ;;  %v862_v32 = vmax.f32 %v810_v28, 0.0  ;;  %v4487_v52 = vpop.permute.xlu1 %1182 }
 0x106   : > { %v758_v53 = vpop.f32.mrf.mxu0  ;;  %v822_v21 = vpop.f32.mrf.mxu1  ;;  %v882_v46 = vpack.c.bf16 %v864_v44, %v863_v43  ;;  %v831_v47 = vadd.f32 %v3725_v19, %v4438_v5 }
 0x107   : > { %v873_v55 = vpack.c.bf16 %v846_v51, %v845_v50  ;;  %v759_v60 = vadd.f32 %v4438_v5, %v758_v53  ;;  %v851_v10 = vmax.f32 %v767_v62, 0.0  ;;  %v823_v36 = vadd.f32 %v4438_v5, %v822_v21  ;;  %v4489_v53 = vpop.permute.xlu0 %1267 }
 0x108   : > { %v3710_v58 = vpop.f32.mrf.mxu0  ;;  %v3726_v30 = vpop.f32.mrf.mxu1  ;;  %v881_v37 = vpack.c.bf16 %v862_v32, %v861_v31  ;;  %v867_v49 = vmax.f32 %v831_v47, 0.0 }
 0x109   : > { %v770_v61 = vadd.f32 %v3710_v58, %v4438_v5  ;;  %3751 = vmatprep.mubr.bf16.mxu1 %v873_v55  ;;  %v849_v8 = vmax.f32 %v759_v60, 0.0  ;;  %v865_v25 = vmax.f32 %v823_v36, 0.0  ;;  %v834_v48 = vadd.f32 %v3726_v30, %v4438_v5  ;;  %v4491_v54 = vpop.permute.xlu1 %1187 }
 0x10a   : > { %v761_v63 = vpop.f32.mrf.mxu0  ;;  %3752 = vmatmul.mubr.bf16.gmra.mxu1 %v874_v57  ;;  %v825_v35 = vpop.f32.mrf.mxu1 }
 0x10b   : > { %v762_v1 = vadd.f32 %v4438_v5, %v761_v63  ;;  %v852_v4 = vmax.f32 %v770_v61, 0.0  ;;  %v826_v38 = vadd.f32 %v4438_v5, %v825_v35  ;;  %v868_v50 = vmax.f32 %v834_v48, 0.0  ;;  %v4493_v55 = vpop.permute.xlu0 %1252 }
 0x10d   : > { %v850_v9 = vmax.f32 %v762_v1, 0.0  ;;  %v876_v17 = vpack.c.bf16 %v852_v4, %v851_v10  ;;  %v866_v42 = vmax.f32 %v826_v38, 0.0  ;;  %v884_v51 = vpack.c.bf16 %v868_v50, %v867_v49  ;;  %v4495_v56 = vpop.permute.xlu1 %1257 }
 0x10f   : > { %v875_v12 = vpack.c.bf16 %v850_v9, %v849_v8  ;;  %v883_v45 = vpack.c.bf16 %v866_v42, %v865_v25  ;;  %v4497_v57 = vpop.permute.xlu0 %1172 }
 0x111   : > { %3755 = vmatprep.mubr.bf16.mxu1 %v875_v12  ;;  %v4499_v5 = vpop.permute.xlu1 %1177 }
 0x112   : > { %3756 = vmatmul.mubr.bf16.gmra.mxu1 %v876_v17 }
 0x113   : > { %3759 = vmatprep.mubr.bf16.mxu1 %v877_v13  ;;  %v4501_v58 = vpop.permute.xlu0 %1242 }
 0x115   : > { %v4503_v59 = vpop.permute.xlu1 %1247 }
 0x117   : > { %v4505_v60 = vpop.permute.xlu0 %1162 }
 0x119   : > { %v4507_v61 = vpop.permute.xlu1 %1167 }
 0x11a   : > { %3760 = vmatmul.mubr.bf16.gmra.mxu1 %v878_v29 }
 0x11b   : > { %3763 = vmatprep.mubr.bf16.mxu1 %v879_v27  ;;  %v4509_v62 = vpop.permute.xlu0 %1232 }
 0x11d   : > { %v4511_v63 = vpop.permute.xlu1 %1237 }
 0x11f   : > { %v4518_v1 = vpop.permute.xlu0 %1152 }
 0x121   : > { %v4520_v3 = vpop.permute.xlu1 %1157 }
 0x122   : > { %3764 = vmatmul.mubr.bf16.gmra.mxu1 %v880_v39 }
 0x123   : > { %3767 = vmatprep.mubr.bf16.mxu1 %v881_v37  ;;  %v4523_v4 = vpop.permute.xlu0 %1222 }
 0x125   : > { %v4525_v6 = vpop.permute.xlu1 %1227 }
 0x127   : > { %v4527_v8 = vpop.permute.xlu0 %1142 }
 0x128   : > { %5558 = vst [vmem:[#allocation3_spill] sm:$0xff] %v4527_v8 }
 0x129   : > { %v4529_v9 = vpop.permute.xlu1 %1147 }
 0x12a   : > { %3768 = vmatmul.mubr.bf16.gmra.mxu1 %v882_v46  ;;  %5559 = vst [vmem:[#allocation4_spill] sm:$0xff] %v4529_v9 }
 0x12b   : > { %3771 = vmatprep.mubr.bf16.mxu1 %v883_v45  ;;  %v4531_v10 = vpop.permute.xlu0 %1212 }
 0x12d   : > { %v4533_v11 = vpop.permute.xlu1 %1217 }
 0x12f   : > { %v4535_v12 = vpop.permute.xlu0 %1132 }
 0x130   : > { %5560 = vst [vmem:[#allocation5_spill] sm:$0xff] %v4535_v12 }
 0x131   : > { %v4537_v13 = vpop.permute.xlu1 %1137 }
 0x132   : > { %3772 = vmatmul.mubr.bf16.gmra.mxu1 %v884_v51  ;;  %5561 = vst [vmem:[#allocation6_spill] sm:$0xff] %v4537_v13 }
 0x133   : > { %v4539_v14 = vpop.permute.xlu0 %1202 }
 0x135   : > { %v4541_v15 = vpop.permute.xlu1 %1207 }
 0x137   : > { %v4545_v19 = vpop.permute.xlu0 %1122 }
 0x138   : > { %5563 = vst [vmem:[#allocation8_spill] sm:$0xff] %v4545_v19 }
 0x139   : > { %v4547_v20 = vpop.permute.xlu1 %1127 }
 0x13a   : > { %5564 = vst [vmem:[#allocation9_spill] sm:$0xff] %v4547_v20 }
 0x1ba   : > { %v3745_v17 = vpop.f32.mrf.mxu1 }
 0x1bb   : > { %v4550_v23 = vmul.f32 %v3745_v17, %v4545_v19 }
 0x1bc   : > { %v4543_v18 = vpop.f32.mrf.mxu1 }
 0x1bd   : > { %5562 = vst [vmem:[#allocation7_spill] sm:$0xff] %v4543_v18  ;;  %5565 = vst [vmem:[#allocation10_spill] sm:$0xff] %v4550_v23 }
 0x1be   : > { %v3746_v22 = vpop.f32.mrf.mxu1 }
 0x1bf   : > { %v4553_v24 = vmul.f32 %v3746_v22, %v4547_v20 }
 0x1c0   : > { %v4555_v21 = vpop.f32.mrf.mxu1 }
 0x1c1   : > { %5566 = vst [vmem:[#allocation11_spill] sm:$0xff] %v4553_v24 }
 0x1c2   : > { %v3749_v27 = vpop.f32.mrf.mxu1 }
 0x1c3   : > { %v4562_v2 = vmul.f32 %v3749_v27, %v4527_v8 }
 0x1c4   : > { %v4559_v28 = vpop.f32.mrf.mxu1 }
 0x1c6   : > { %v3750_v29 = vpop.f32.mrf.mxu1 }
 0x1c7   : > { %v4565_v7 = vmul.f32 %v3750_v29, %v4529_v9 }
 0x1c8   : > { %v4567_v30 = vpop.f32.mrf.mxu1 }
 0x1ca   : > { %v3753_v32 = vpop.f32.mrf.mxu1 }
 0x1cc   : > { %v1015_v33 = vpop.f32.mrf.mxu1 }
 0x1ce   : > { %v3754_v34 = vpop.f32.mrf.mxu1 }
 0x1d0   : > { %v1018_v35 = vpop.f32.mrf.mxu1 }
 0x1d2   : > { %v3757_v36 = vpop.f32.mrf.mxu1 }
 0x1d3   : > { %v1284_v31 = vmul.f32 %v3757_v36, %v4487_v52  ;;  %v1281_v36 = vmul.f32 %v3754_v34, %v4507_v61 }
 0x1d4   : > { %v1031_v37 = vpop.f32.mrf.mxu1 }
 0x1d6   : > { %v3758_v38 = vpop.f32.mrf.mxu1 }
 0x1d7   : > { %v1285_v22 = vmul.f32 %v3758_v38, %v4491_v54  ;;  %v1282_v38 = vmul.f32 %v4497_v57, %v1031_v37  ;;  %v4594_v37 = vpop.permute.xlu1 %1197 }
 0x1d8   : > { %v1034_v39 = vpop.f32.mrf.mxu1 }
 0x1d9   : > { %v1341_v19 = vpack.c.bf16 %v1285_v22, %v1284_v31  ;;  %v1283_v23 = vmul.f32 %v4499_v5, %v1034_v39  ;;  %v4027_v22 = vld [vmem:[%s5497_s7 + $0x30] sm:$0xff]  }
 0x1da   : > { %v3761_v16 = vpop.f32.mrf.mxu1 }
 0x1dc   : > { %v4571_v40 = vpop.f32.mrf.mxu1 }
 0x1de   : > { %v3762_v25 = vpop.f32.mrf.mxu1 }
 0x1e0   : > { %v4573_v42 = vpop.f32.mrf.mxu1 }
 0x1e2   : > { %v3765_v43 = vpop.f32.mrf.mxu1 }
 0x1e4   : > { %v1063_v44 = vpop.f32.mrf.mxu1 }
 0x1e5   : > { %v1290_v39 = vmul.f32 %v4531_v10, %v1063_v44 }
 0x1e6   : > { %v3766_v45 = vpop.f32.mrf.mxu1 }
 0x1e8   : > { %v1066_v46 = vpop.f32.mrf.mxu1 }
 0x1ea   : > { %v3769_v47 = vpop.f32.mrf.mxu1 }
 0x1ec   : > { %v1079_v48 = vpop.f32.mrf.mxu1 }
 0x1ed   : > { %v1294_v31 = vmul.f32 %v4509_v62, %v1079_v48  ;;  %v1288_v48 = vmul.f32 %v3761_v16, %v4539_v14  ;;  %v4026_v16 = vld [vmem:[%s5497_s7 + $0x38] sm:$0xff]  }
 0x1ee   : > { %v3770_v49 = vpop.f32.mrf.mxu1  ;;  %3775 = vmatprep.subr.bf16.mxu1 %v4026_v16 }
 0x1ef   : > { %v1297_v24 = vmul.f32 %v3770_v49, %v4503_v59  ;;  %v4608_v49 = vpop.permute.xlu1 %1117  ;;  %3776 = vmatpush3.bf16.msra.mxu1 %v4026_v16  ;;  %v4782_v16 = vld [vmem:[%s5490_s0 + $0xb0] ss:$8 sps:$4 sm:$0xff]  }
 0x1f0   : > { %v1082_v50 = vpop.f32.mrf.mxu1  ;;  %5568 = vst [vmem:[#allocation12_spill] sm:$0xff] %v4608_v49  ;;  %3777 = vmatprep.subr.bf16.mxu1 %v4027_v22  ;;  %5596 = vst [vmem:[#allocation33_spill] sm:$0xff] %v4782_v16 }
 0x1f2   : > { %v3773_v51 = vpop.f32.mrf.mxu1 }
 0x1f3   : > { %v1300_v29 = vmul.f32 %v3773_v51, %v4485_v41  ;;  %v1296_v51 = vmul.f32 %v3769_v47, %v4501_v58  ;;  %3778 = vmatpush3.bf16.msra.mxu1 %v4027_v22  ;;  %v4787_v22 = vld [vmem:[%s5490_s0 + $0xc4] ss:$8 sps:$4 sm:$0xff]  }
 0x1f4   : > { %v1095_v17 = vpop.f32.mrf.mxu1  ;;  %5597 = vst [vmem:[#allocation34_spill] sm:$0xff] %v4787_v22 }
 0x1f5   : > { %v1298_v9 = vmul.f32 %v4493_v55, %v1095_v17  ;;  %v1347_v17 = vpack.c.bf16 %v1297_v24, %v1296_v51  ;;  %v5572_v51 = vld [vmem:[#allocation10_spill] sm:$0xff] }
 0x1f6   : > { %v3774_v27 = vpop.f32.mrf.mxu1 }
 0x1f7   : > { %v1301_v26 = vmul.f32 %v3774_v27, %v4489_v53  ;;  %v1340_v27 = vpack.c.bf16 %v1283_v23, %v1282_v38  ;;  %v1292_v23 = vmul.f32 %v3765_v43, %v4523_v4  ;;  %v1274_v43 = vmul.f32 %v4535_v12, %v4559_v28  ;;  %v5571_v38 = vld [vmem:[#allocation11_spill] sm:$0xff] }
 0x1f8   : > { %v1098_v0 = vpop.f32.mrf.mxu1 }
 0x1f9   : > { %v1349_v8 = vpack.c.bf16 %v1301_v26, %v1300_v29  ;;  %v1299_v20 = vmul.f32 %v4495_v56, %v1098_v0  ;;  %v1295_v26 = vmul.f32 %v4511_v63, %v1082_v50  ;;  %v1280_v0 = vmul.f32 %v3753_v32, %v4505_v60 }
 0x1fa   : > { %v1291_v32 = vmul.f32 %v4533_v11, %v1066_v46  ;;  %v5567_v46 = vpack.c.bf16 %v4565_v7, %v4562_v2  ;;  %v1271_v2 = vmul.f32 %v4608_v49, %v4555_v21  ;;  %v4632_v21 = vld [vmem:[%s5490_s0] ss:$8 sps:$4 sm:$0xff]  }
 0x1fb   : > { %v1348_v18 = vpack.c.bf16 %v1299_v20, %v1298_v9  ;;  %3383 = vmatprep.subr.bf16.mxu0 %v1349_v8  ;;  %v1339_v9 = vpack.c.bf16 %v1281_v36, %v1280_v0  ;;  %v1279_v8 = vmul.f32 %v4520_v3, %v1018_v35  ;;  %v1346_v20 = vpack.c.bf16 %v1295_v26, %v1294_v31  ;;  %v4649_v26 = vld [vmem:[%s5490_s0 + $0x24] ss:$8 sps:$4 sm:$0xff]   ;;  %v4656_v0 = vld [vmem:[%s5490_s0 + $0x20] ss:$8 sps:$4 sm:$0xff]   ;;  %v4661_v31 = vld [vmem:[%s5490_s0 + $0x34] ss:$8 sps:$4 sm:$0xff]  }
 0x1fc   : > { %3384 = vmatpush3.bf16.msra.mxu0 %v1341_v19  ;;  %v1293_v19 = vmul.f32 %v3766_v45, %v4525_v6  ;;  %v1275_v35 = vmul.f32 %v4537_v13, %v4567_v30  ;;  %v4599_v45 = vpop.permute.xlu0 %1192  ;;  %v1344_v47 = vpack.c.bf16 %v1291_v32, %v1290_v39  ;;  %v1287_v30 = vmul.f32 %v4594_v37, %v4573_v42  ;;  %v5570_v42 = vld [vmem:[#allocation7_spill] sm:$0xff]  ;;  %v4716_v32 = vld [vmem:[%s5490_s0 + $0x70] ss:$8 sps:$4 sm:$0xff]  }
 0x1fd   : > { %3385 = vmatprep.subr.bf16.mxu0 %v1348_v18  ;;  %v1278_v18 = vmul.f32 %v4518_v1, %v1015_v33  ;;  %v1289_v33 = vmul.f32 %v3762_v25, %v4541_v15  ;;  %v1286_v28 = vmul.f32 %v4599_v45, %v4571_v40  ;;  %v5573_v36 = vpack.c.bf16 %v5571_v38, %v5572_v51  ;;  %v4721_v39 = vld [vmem:[%s5490_s0 + $0x84] ss:$8 sps:$4 sm:$0xff]   ;;  %v4806_v38 = vld [vmem:[%s5490_s0 + $0xd0] ss:$8 sps:$4 sm:$0xff]  }
 0x1fe   : > { %v1345_v34 = vpack.c.bf16 %v1293_v19, %v1292_v23  ;;  %v1336_v44 = vpack.c.bf16 %v1275_v35, %v1274_v43  ;;  %5574 = vst [vmem:[#allocation7_spill] sm:$0xff] %v4632_v21  ;;  %5577 = vst [vmem:[#allocation14_spill] sm:$0xff] %v4649_v26  ;;  %v4680_v19 = vld [vmem:[%s5490_s0 + $0x40] ss:$8 sps:$4 sm:$0xff]   ;;  %v4697_v23 = vld [vmem:[%s5490_s0 + $0x64] ss:$8 sps:$4 sm:$0xff]  }
 0x1ff   : > { %v1338_v24 = vpack.c.bf16 %v1279_v8, %v1278_v18  ;;  %v1343_v50 = vpack.c.bf16 %v1289_v33, %v1288_v48  ;;  %v1342_v7 = vpack.c.bf16 %v1287_v30, %v1286_v28  ;;  %5578 = vst [vmem:[#allocation15_spill] sm:$0xff] %v4656_v0  ;;  %5579 = vst [vmem:[#allocation16_spill] sm:$0xff] %v4661_v31  ;;  %v4673_v8 = vld [vmem:[%s5490_s0 + $0x44] ss:$8 sps:$4 sm:$0xff]   ;;  %v4692_v18 = vld [vmem:[%s5490_s0 + $0x50] ss:$8 sps:$4 sm:$0xff]  }
 0x200   : > { %3386 = vmatpush3.bf16.msra.mxu0 %v1340_v27  ;;  %v4612_v25 = vpop.permute.xlu0 %1112  ;;  %v4637_v27 = vld [vmem:[%s5490_s0 + $0x14] ss:$8 sps:$4 sm:$0xff]   ;;  %5581 = vst [vmem:[#allocation18_spill] sm:$0xff] %v4673_v8  ;;  %5582 = vst [vmem:[#allocation19_spill] sm:$0xff] %v4680_v19  ;;  %v4728_v35 = vld [vmem:[%s5490_s0 + $0x80] ss:$8 sps:$4 sm:$0xff]  }
 0x201   : > { %3387 = vmatprep.subr.bf16.mxu0 %v1347_v17  ;;  %5569 = vst [vmem:[#allocation13_spill] sm:$0xff] %v4612_v25  ;;  %v1270_v29 = vmul.f32 %v4612_v25, %v5570_v42  ;;  %5575 = vst [vmem:[#allocation11_spill] sm:$0xff] %v4637_v27  ;;  %v4644_v17 = vld [vmem:[%s5490_s0 + $0x10] ss:$8 sps:$4 sm:$0xff]   ;;  %v4733_v33 = vld [vmem:[%s5490_s0 + $0x94] ss:$8 sps:$4 sm:$0xff]  }
 0x202   : > { %5576 = vst [vmem:[#allocation10_spill] sm:$0xff] %v4644_v17  ;;  %5584 = vst [vmem:[#allocation21_spill] sm:$0xff] %v4692_v18  ;;  %v4029_v43 = vld [vmem:[%s5497_s7 + $0x20] sm:$0xff]   ;;  %v4769_v28 = vld [vmem:[%s5490_s0 + $0xb4] ss:$8 sps:$4 sm:$0xff]  }
 0x203   : > { %v1334_v40 = vpack.c.bf16 %v1271_v2, %v1270_v29  ;;  %5585 = vst [vmem:[#allocation22_spill] sm:$0xff] %v4697_v23  ;;  %5588 = vst [vmem:[#allocation25_spill] sm:$0xff] %v4716_v32  ;;  %v4751_v48 = vld [vmem:[%s5490_s0 + $0xa4] ss:$8 sps:$4 sm:$0xff]   ;;  %v4764_v30 = vld [vmem:[%s5490_s0 + $0xa0] ss:$8 sps:$4 sm:$0xff]  }
 0x204   : > { %3388 = vmatpush3.bf16.msra.mxu0 %v1339_v9  ;;  %v4668_v9 = vld [vmem:[%s5490_s0 + $0x30] ss:$8 sps:$4 sm:$0xff]   ;;  %5589 = vst [vmem:[#allocation26_spill] sm:$0xff] %v4721_v39  ;;  %5590 = vst [vmem:[#allocation27_spill] sm:$0xff] %v4728_v35  ;;  %v4032_v2 = vld [vmem:[%s5497_s7 + $0x8] sm:$0xff]  }
 0x205   : > { %3389 = vmatprep.subr.bf16.mxu0 %v1346_v20  ;;  %5580 = vst [vmem:[#allocation17_spill] sm:$0xff] %v4668_v9  ;;  %v4685_v20 = vld [vmem:[%s5490_s0 + $0x54] ss:$8 sps:$4 sm:$0xff]   ;;  %5591 = vst [vmem:[#allocation28_spill] sm:$0xff] %v4733_v33  ;;  %v4794_v42 = vld [vmem:[%s5490_s0 + $0xc0] ss:$8 sps:$4 sm:$0xff]  }
 0x206   : > { %5583 = vst [vmem:[#allocation20_spill] sm:$0xff] %v4685_v20  ;;  %5593 = vst [vmem:[#allocation30_spill] sm:$0xff] %v4751_v48  ;;  %v4799_v29 = vld [vmem:[%s5490_s0 + $0xd4] ss:$8 sps:$4 sm:$0xff]   ;;  %v4811_v51 = vld [vmem:[%s5490_s0 + $0xe4] ss:$8 sps:$4 sm:$0xff]  }
 0x207   : > { %5594 = vst [vmem:[#allocation31_spill] sm:$0xff] %v4764_v30  ;;  %5595 = vst [vmem:[#allocation32_spill] sm:$0xff] %v4769_v28 }
 0x208   : > { %3390 = vmatpush3.bf16.msra.mxu0 %v1338_v24  ;;  %v4704_v24 = vld [vmem:[%s5490_s0 + $0x60] ss:$8 sps:$4 sm:$0xff]   ;;  %5598 = vst [vmem:[#allocation35_spill] sm:$0xff] %v4794_v42  ;;  %5599 = vst [vmem:[#allocation36_spill] sm:$0xff] %v4799_v29 }
 0x209   : > { %3391 = vmatprep.subr.bf16.mxu0 %v1345_v34  ;;  %5586 = vst [vmem:[#allocation23_spill] sm:$0xff] %v4704_v24  ;;  %v4709_v34 = vld [vmem:[%s5490_s0 + $0x74] ss:$8 sps:$4 sm:$0xff]   ;;  %5600 = vst [vmem:[#allocation37_spill] sm:$0xff] %v4806_v38 }
 0x20a   : > { %5587 = vst [vmem:[#allocation24_spill] sm:$0xff] %v4709_v34  ;;  %5601 = vst [vmem:[#allocation38_spill] sm:$0xff] %v4811_v51 }
 0x20c   : > { %3392 = vmatpush3.bf16.msra.mxu0 %v5567_v46  ;;  %v4746_v46 = vld [vmem:[%s5490_s0 + $0x90] ss:$8 sps:$4 sm:$0xff]  }
 0x20d   : > { %3393 = vmatprep.subr.bf16.mxu0 %v1344_v47  ;;  %v4028_v47 = vld [vmem:[%s5497_s7 + $0x28] sm:$0xff]   ;;  %5592 = vst [vmem:[#allocation29_spill] sm:$0xff] %v4746_v46 }
 0x20e   : > { %3779 = vmatprep.subr.bf16.mxu1 %v4028_v47 }
 0x20f   : > { %3780 = vmatpush3.bf16.msra.mxu1 %v4028_v47  ;;  %v4830_v47 = vld [vmem:[%s5490_s0 + $0xf0] ss:$8 sps:$4 sm:$0xff]  }
 0x210   : > { %3394 = vmatpush3.bf16.msra.mxu0 %v1336_v44  ;;  %3781 = vmatprep.subr.bf16.mxu1 %v4029_v43  ;;  %v4030_v44 = vld [vmem:[%s5497_s7 + $0x18] sm:$0xff]   ;;  %5604 = vst [vmem:[#allocation41_spill] sm:$0xff] %v4830_v47 }
 0x211   : > { %3395 = vmatprep.subr.bf16.mxu0 %v1343_v50  ;;  %v4031_v50 = vld [vmem:[%s5497_s7 + $0x10] sm:$0xff]  }
 0x213   : > { %3782 = vmatpush3.bf16.msra.mxu1 %v4029_v43 }
 0x214   : > { %3396 = vmatpush3.bf16.msra.mxu0 %v5573_v36  ;;  %3783 = vmatprep.subr.bf16.mxu1 %v4030_v44  ;;  %v4818_v36 = vld [vmem:[%s5490_s0 + $0xe0] ss:$8 sps:$4 sm:$0xff]  }
 0x215   : > { %3397 = vmatprep.subr.bf16.mxu0 %v1342_v7  ;;  %v4033_v7 = vld [vmem:[%s5497_s7] sm:$0xff]   ;;  %5602 = vst [vmem:[#allocation39_spill] sm:$0xff] %v4818_v36 }
 0x217   : > { %3784 = vmatpush3.bf16.msra.mxu1 %v4030_v44 }
 0x218   : > { %3398 = vmatpush3.bf16.msra.mxu0 %v1334_v40  ;;  %3785 = vmatprep.subr.bf16.mxu1 %v4031_v50  ;;  %v4823_v40 = vld [vmem:[%s5490_s0 + $0xf4] ss:$8 sps:$4 sm:$0xff]  }
 0x219   : > { %5603 = vst [vmem:[#allocation40_spill] sm:$0xff] %v4823_v40 }
 0x21b   : > { %1543 = vmatmul.mubr.bf16.vlgmr.msra.gmra.mxu0 %v4632_v21  ;;  %3786 = vmatpush3.bf16.msra.mxu1 %v4031_v50 }
 0x21c   : > { %1550 = vmatprep.mubr.bf16.mxu0 %v4637_v27  ;;  %3787 = vmatprep.subr.bf16.mxu1 %v4032_v2 }
 0x21f   : > { %3788 = vmatpush3.bf16.msra.mxu1 %v4032_v2 }
 0x220   : > { %3789 = vmatprep.subr.bf16.mxu1 %v4033_v7 }
 0x223   : > { %1551 = vmatmul.mubr.bf16.gmra.mxu0 %v4644_v17  ;;  %3790 = vmatpush3.bf16.msra.mxu1 %v4033_v7 }
 0x224   : > { %1558 = vmatprep.mubr.bf16.mxu0 %v4649_v26 }
 0x22b   : > { %1559 = vmatmul.mubr.bf16.gmra.mxu0 %v4656_v0 }
 0x22c   : > { %1566 = vmatprep.mubr.bf16.mxu0 %v4661_v31 }
 0x233   : > { %1567 = vmatmul.mubr.bf16.gmra.mxu0 %v4668_v9 }
 0x234   : > { %1574 = vmatprep.mubr.bf16.mxu0 %v4673_v8 }
 0x23b   : > { %1575 = vmatmul.mubr.bf16.gmra.mxu0 %v4680_v19 }
 0x23c   : > { %1582 = vmatprep.mubr.bf16.mxu0 %v4685_v20 }
 0x243   : > { %1583 = vmatmul.mubr.bf16.gmra.mxu0 %v4692_v18 }
 0x244   : > { %1590 = vmatprep.mubr.bf16.mxu0 %v4697_v23 }
 0x24b   : > { %1591 = vmatmul.mubr.bf16.gmra.mxu0 %v4704_v24 }
 0x24c   : > { %1598 = vmatprep.mubr.bf16.mxu0 %v4709_v34 }
 0x253   : > { %1599 = vmatmul.mubr.bf16.gmra.mxu0 %v4716_v32 }
 0x254   : > { %1606 = vmatprep.mubr.bf16.mxu0 %v4721_v39 }
 0x25b   : > { %1607 = vmatmul.mubr.bf16.gmra.mxu0 %v4728_v35 }
 0x25c   : > { %1614 = vmatprep.mubr.bf16.mxu0 %v4733_v33 }
 0x263   : > { %1615 = vmatmul.mubr.bf16.gmra.mxu0 %v4746_v46 }
 0x264   : > { %1622 = vmatprep.mubr.bf16.mxu0 %v4751_v48 }
 0x26b   : > { %1623 = vmatmul.mubr.bf16.gmra.mxu0 %v4764_v30 }
 0x26c   : > { %1630 = vmatprep.mubr.bf16.mxu0 %v4769_v28  ;;  %v5605_v28 = vld [vmem:[#allocation8_spill] sm:$0xff] }
 0x273   : > { %1631 = vmatmul.mubr.bf16.gmra.mxu0 %v4782_v16 }
 0x274   : > { %1638 = vmatprep.mubr.bf16.mxu0 %v4787_v22 }
 0x27b   : > { %1639 = vmatmul.mubr.bf16.gmra.mxu0 %v4794_v42 }
 0x27c   : > { %1646 = vmatprep.mubr.bf16.mxu0 %v4799_v29 }
 0x283   : > { %1647 = vmatmul.mubr.bf16.gmra.mxu0 %v4806_v38 }
 0x284   : > { %1654 = vmatprep.mubr.bf16.mxu0 %v4811_v51  ;;  %v4837_v51 = vld [vmem:[%s5496_s6] ss:$0 sm:$0xff] }
 0x28b   : > { %1655 = vmatmul.mubr.bf16.gmra.mxu0 %v4818_v36 }
 0x28c   : > { %1662 = vmatprep.mubr.bf16.mxu0 %v4823_v40 }
 0x293   : > { %1663 = vmatmul.mubr.bf16.gmra.mxu0 %v4830_v47 }
 0x2db   : > { %v3399_v43 = vpop.f32.mrf.mxu0 }
 0x2dd   : > { %v3400_v44 = vpop.f32.mrf.mxu0 }
 0x2de   : > { %v3401_v50 = vadd.f32 %v3400_v44, %v3399_v43 }
 0x2df   : > { %v3402_v2 = vpop.f32.mrf.mxu0 }
 0x2e0   : > { %v1671_v7 = vmul.f32 %v3401_v50, %v4612_v25 }
 0x2e1   : > { %v3403_v36 = vpop.f32.mrf.mxu0 }
 0x2e2   : > { %v3404_v40 = vadd.f32 %v3403_v36, %v3402_v2  ;;  %v1710_v29 = vadd.f32 %v4837_v51, %v1671_v7  ;;  %v5606_v2 = vld [vmem:[#allocation9_spill] sm:$0xff] }
 0x2e3   : > { %v3405_v38 = vpop.f32.mrf.mxu0 }
 0x2e4   : > { %v1672_v42 = vmul.f32 %v3404_v40, %v4608_v49  ;;  %v1742_v44 = vmax.f32 %v1710_v29, 0.0 }
 0x2e5   : > { %v3406_v22 = vpop.f32.mrf.mxu0 }
 0x2e6   : > { %v1711_v47 = vadd.f32 %v4837_v51, %v1672_v42  ;;  %v3407_v16 = vadd.f32 %v3406_v22, %v3405_v38 }
 0x2e7   : > { %v3408_v43 = vpop.f32.mrf.mxu0 }
 0x2e8   : > { %v1673_v50 = vmul.f32 %v3407_v16, %v5605_v28  ;;  %v1743_v30 = vmax.f32 %v1711_v47, 0.0 }
 0x2e9   : > { %v3409_v48 = vpop.f32.mrf.mxu0 }
 0x2ea   : > { %v3410_v46 = vadd.f32 %v3409_v48, %v3408_v43  ;;  %v1774_v33 = vpack.c.bf16 %v1743_v30, %v1742_v44  ;;  %v1712_v36 = vadd.f32 %v4837_v51, %v1673_v50  ;;  %v5607_v50 = vld [vmem:[#allocation3_spill] sm:$0xff] }
 0x2eb   : > { %v3411_v35 = vpop.f32.mrf.mxu0 }
 0x2ec   : > { %v1674_v39 = vmul.f32 %v3410_v46, %v5606_v2  ;;  %3791 = vmatprep.mubr.bf16.mxu1 %v1774_v33  ;;  %v1744_v22 = vmax.f32 %v1712_v36, 0.0 }
 0x2ed   : > { %v3412_v7 = vpop.f32.mrf.mxu0 }
 0x2ee   : > { %v1713_v40 = vadd.f32 %v4837_v51, %v1674_v39  ;;  %v3413_v32 = vadd.f32 %v3412_v7, %v3411_v35 }
 0x2ef   : > { %v3414_v42 = vpop.f32.mrf.mxu0 }
 0x2f0   : > { %v1745_v38 = vmax.f32 %v1713_v40, 0.0  ;;  %v1675_v29 = vmul.f32 %v3413_v32, %v4535_v12 }
 0x2f1   : > { %v3415_v16 = vpop.f32.mrf.mxu0 }
 0x2f2   : > { %v1775_v47 = vpack.c.bf16 %v1745_v38, %v1744_v22  ;;  %v3416_v34 = vadd.f32 %v3415_v16, %v3414_v42  ;;  %v1714_v30 = vadd.f32 %v4837_v51, %v1675_v29  ;;  %v5608_v38 = vld [vmem:[#allocation4_spill] sm:$0xff] }
 0x2f3   : > { %v3417_v48 = vpop.f32.mrf.mxu0 }
 0x2f4   : > { %v1676_v43 = vmul.f32 %v3416_v34, %v4537_v13  ;;  %3792 = vmatmul.mubr.bf16.vlgmr.msra.gmra.mxu1 %v1775_v47  ;;  %v1746_v35 = vmax.f32 %v1714_v30, 0.0 }
 0x2f5   : > { %v3418_v46 = vpop.f32.mrf.mxu0 }
 0x2f6   : > { %v1715_v33 = vadd.f32 %v4837_v51, %v1676_v43  ;;  %v3419_v44 = vadd.f32 %v3418_v46, %v3417_v48 }
 0x2f7   : > { %v3420_v39 = vpop.f32.mrf.mxu0 }
 0x2f8   : > { %v1677_v36 = vmul.f32 %v3419_v44, %v5607_v50  ;;  %v1747_v7 = vmax.f32 %v1715_v33, 0.0 }
 0x2f9   : > { %v3421_v40 = vpop.f32.mrf.mxu0 }
 0x2fa   : > { %v3422_v32 = vadd.f32 %v3421_v40, %v3420_v39  ;;  %v1776_v24 = vpack.c.bf16 %v1747_v7, %v1746_v35  ;;  %v1716_v42 = vadd.f32 %v4837_v51, %v1677_v36 }
 0x2fb   : > { %v3423_v22 = vpop.f32.mrf.mxu0 }
 0x2fc   : > { %v1678_v29 = vmul.f32 %v3422_v32, %v5608_v38  ;;  %3795 = vmatprep.mubr.bf16.mxu1 %v1776_v24  ;;  %v1748_v48 = vmax.f32 %v1716_v42, 0.0 }
 0x2fd   : > { %v3424_v34 = vpop.f32.mrf.mxu0 }
 0x2fe   : > { %v1717_v16 = vadd.f32 %v4837_v51, %v1678_v29  ;;  %v3425_v47 = vadd.f32 %v3424_v34, %v3423_v22 }
 0x2ff   : > { %v3426_v43 = vpop.f32.mrf.mxu0 }
 0x300   : > { %v1679_v30 = vmul.f32 %v3425_v47, %v4518_v1  ;;  %v1749_v46 = vmax.f32 %v1717_v16, 0.0 }
 0x301   : > { %v3427_v44 = vpop.f32.mrf.mxu0 }
 0x302   : > { %v3428_v33 = vadd.f32 %v3427_v44, %v3426_v43  ;;  %v1777_v23 = vpack.c.bf16 %v1749_v46, %v1748_v48  ;;  %v1718_v35 = vadd.f32 %v4837_v51, %v1679_v30 }
 0x303   : > { %v3429_v39 = vpop.f32.mrf.mxu0 }
 0x304   : > { %v1680_v36 = vmul.f32 %v3428_v33, %v4520_v3  ;;  %3796 = vmatmul.mubr.bf16.gmra.mxu1 %v1777_v23  ;;  %v1750_v22 = vmax.f32 %v1718_v35, 0.0 }
 0x305   : > { %v3430_v7 = vpop.f32.mrf.mxu0 }
 0x306   : > { %v1719_v24 = vadd.f32 %v4837_v51, %v1680_v36  ;;  %v3431_v40 = vadd.f32 %v3430_v7, %v3429_v39 }
 0x307   : > { %v3432_v32 = vpop.f32.mrf.mxu0 }
 0x308   : > { %v1751_v29 = vmax.f32 %v1719_v24, 0.0  ;;  %v1681_v42 = vmul.f32 %v3431_v40, %v4505_v60 }
 0x309   : > { %v3433_v34 = vpop.f32.mrf.mxu0 }
 0x30a   : > { %v3434_v16 = vadd.f32 %v3433_v34, %v3432_v32  ;;  %v1778_v47 = vpack.c.bf16 %v1751_v29, %v1750_v22  ;;  %v1720_v48 = vadd.f32 %v4837_v51, %v1681_v42 }
 0x30b   : > { %v3435_v43 = vpop.f32.mrf.mxu0 }
 0x30c   : > { %v1682_v30 = vmul.f32 %v3434_v16, %v4507_v61  ;;  %3799 = vmatprep.mubr.bf16.mxu1 %v1778_v47  ;;  %v1752_v39 = vmax.f32 %v1720_v48, 0.0 }
 0x30d   : > { %v3436_v46 = vpop.f32.mrf.mxu0 }
 0x30e   : > { %v1721_v23 = vadd.f32 %v4837_v51, %v1682_v30  ;;  %v3437_v44 = vadd.f32 %v3436_v46, %v3435_v43 }
 0x30f   : > { %v3438_v33 = vpop.f32.mrf.mxu0 }
 0x310   : > { %v1753_v36 = vmax.f32 %v1721_v23, 0.0  ;;  %v1683_v35 = vmul.f32 %v3437_v44, %v4497_v57 }
 0x311   : > { %v3439_v7 = vpop.f32.mrf.mxu0 }
 0x312   : > { %v3440_v24 = vadd.f32 %v3439_v7, %v3438_v33  ;;  %v1779_v40 = vpack.c.bf16 %v1753_v36, %v1752_v39  ;;  %v1722_v22 = vadd.f32 %v4837_v51, %v1683_v35 }
 0x313   : > { %v3441_v32 = vpop.f32.mrf.mxu0 }
 0x314   : > { %v1684_v29 = vmul.f32 %v3440_v24, %v4499_v5  ;;  %3800 = vmatmul.mubr.bf16.gmra.mxu1 %v1779_v40  ;;  %v1754_v43 = vmax.f32 %v1722_v22, 0.0 }
 0x315   : > { %v3442_v42 = vpop.f32.mrf.mxu0 }
 0x316   : > { %v1723_v34 = vadd.f32 %v4837_v51, %v1684_v29  ;;  %v3443_v16 = vadd.f32 %v3442_v42, %v3441_v32 }
 0x317   : > { %v3444_v47 = vpop.f32.mrf.mxu0 }
 0x318   : > { %v1755_v30 = vmax.f32 %v1723_v34, 0.0  ;;  %v1685_v48 = vmul.f32 %v3443_v16, %v4487_v52 }
 0x319   : > { %v3445_v46 = vpop.f32.mrf.mxu0 }
 0x31a   : > { %v3446_v23 = vadd.f32 %v3445_v46, %v3444_v47  ;;  %v1780_v44 = vpack.c.bf16 %v1755_v30, %v1754_v43  ;;  %v1724_v39 = vadd.f32 %v4837_v51, %v1685_v48 }
 0x31b   : > { %v3447_v33 = vpop.f32.mrf.mxu0 }
 0x31c   : > { %v1686_v36 = vmul.f32 %v3446_v23, %v4491_v54  ;;  %3803 = vmatprep.mubr.bf16.mxu1 %v1780_v44  ;;  %v1756_v32 = vmax.f32 %v1724_v39, 0.0 }
 0x31d   : > { %v3448_v35 = vpop.f32.mrf.mxu0 }
 0x31e   : > { %v1725_v7 = vadd.f32 %v4837_v51, %v1686_v36  ;;  %v3449_v24 = vadd.f32 %v3448_v35, %v3447_v33 }
 0x31f   : > { %v3450_v40 = vpop.f32.mrf.mxu0 }
 0x320   : > { %v1757_v29 = vmax.f32 %v1725_v7, 0.0  ;;  %v1687_v22 = vmul.f32 %v3449_v24, %v4599_v45 }
 0x321   : > { %v3451_v42 = vpop.f32.mrf.mxu0 }
 0x322   : > { %v3452_v34 = vadd.f32 %v3451_v42, %v3450_v40  ;;  %v1781_v16 = vpack.c.bf16 %v1757_v29, %v1756_v32  ;;  %v1726_v43 = vadd.f32 %v4837_v51, %v1687_v22 }
 0x323   : > { %v3453_v47 = vpop.f32.mrf.mxu0 }
 0x324   : > { %v1688_v30 = vmul.f32 %v3452_v34, %v4594_v37  ;;  %3804 = vmatmul.mubr.bf16.gmra.mxu1 %v1781_v16  ;;  %v1758_v33 = vmax.f32 %v1726_v43, 0.0 }
 0x325   : > { %v3454_v48 = vpop.f32.mrf.mxu0 }
 0x326   : > { %v1727_v46 = vadd.f32 %v4837_v51, %v1688_v30  ;;  %v3455_v23 = vadd.f32 %v3454_v48, %v3453_v47 }
 0x327   : > { %v3456_v44 = vpop.f32.mrf.mxu0 }
 0x328   : > { %v1759_v36 = vmax.f32 %v1727_v46, 0.0  ;;  %v1689_v39 = vmul.f32 %v3455_v23, %v4539_v14 }
 0x329   : > { %v3457_v35 = vpop.f32.mrf.mxu0 }
 0x32a   : > { %v3458_v7 = vadd.f32 %v3457_v35, %v3456_v44  ;;  %v1782_v24 = vpack.c.bf16 %v1759_v36, %v1758_v33  ;;  %v1728_v32 = vadd.f32 %v4837_v51, %v1689_v39 }
 0x32b   : > { %v3459_v40 = vpop.f32.mrf.mxu0 }
 0x32c   : > { %v1690_v29 = vmul.f32 %v3458_v7, %v4541_v15  ;;  %3807 = vmatprep.mubr.bf16.mxu1 %v1782_v24  ;;  %v1760_v47 = vmax.f32 %v1728_v32, 0.0 }
 0x32d   : > { %v3460_v22 = vpop.f32.mrf.mxu0 }
 0x32e   : > { %v1729_v42 = vadd.f32 %v4837_v51, %v1690_v29  ;;  %v3461_v34 = vadd.f32 %v3460_v22, %v3459_v40 }
 0x32f   : > { %v3462_v16 = vpop.f32.mrf.mxu0 }
 0x330   : > { %v1761_v30 = vmax.f32 %v1729_v42, 0.0  ;;  %v1691_v43 = vmul.f32 %v3461_v34, %v4531_v10 }
 0x331   : > { %v3463_v48 = vpop.f32.mrf.mxu0 }
 0x332   : > { %v3464_v46 = vadd.f32 %v3463_v48, %v3462_v16  ;;  %v1783_v23 = vpack.c.bf16 %v1761_v30, %v1760_v47  ;;  %v1730_v33 = vadd.f32 %v4837_v51, %v1691_v43 }
 0x333   : > { %v3465_v44 = vpop.f32.mrf.mxu0 }
 0x334   : > { %v1692_v36 = vmul.f32 %v3464_v46, %v4533_v11  ;;  %3808 = vmatmul.mubr.bf16.gmra.mxu1 %v1783_v23  ;;  %v1762_v40 = vmax.f32 %v1730_v33, 0.0 }
 0x335   : > { %v3466_v39 = vpop.f32.mrf.mxu0 }
 0x336   : > { %v1731_v35 = vadd.f32 %v4837_v51, %v1692_v36  ;;  %v3467_v7 = vadd.f32 %v3466_v39, %v3465_v44 }
 0x337   : > { %v3468_v24 = vpop.f32.mrf.mxu0 }
 0x338   : > { %v1763_v29 = vmax.f32 %v1731_v35, 0.0  ;;  %v1693_v32 = vmul.f32 %v3467_v7, %v4523_v4 }
 0x339   : > { %v3469_v22 = vpop.f32.mrf.mxu0 }
 0x33a   : > { %v3470_v42 = vadd.f32 %v3469_v22, %v3468_v24  ;;  %v1784_v34 = vpack.c.bf16 %v1763_v29, %v1762_v40  ;;  %v1732_v47 = vadd.f32 %v4837_v51, %v1693_v32 }
 0x33b   : > { %v3471_v16 = vpop.f32.mrf.mxu0 }
 0x33c   : > { %v1694_v30 = vmul.f32 %v3470_v42, %v4525_v6  ;;  %3811 = vmatprep.mubr.bf16.mxu1 %v1784_v34  ;;  %v1764_v44 = vmax.f32 %v1732_v47, 0.0 }
 0x33d   : > { %v3472_v43 = vpop.f32.mrf.mxu0 }
 0x33e   : > { %v1733_v48 = vadd.f32 %v4837_v51, %v1694_v30  ;;  %v3473_v46 = vadd.f32 %v3472_v43, %v3471_v16 }
 0x33f   : > { %v3474_v23 = vpop.f32.mrf.mxu0 }
 0x340   : > { %v1765_v36 = vmax.f32 %v1733_v48, 0.0  ;;  %v1695_v33 = vmul.f32 %v3473_v46, %v4509_v62 }
 0x341   : > { %v3475_v39 = vpop.f32.mrf.mxu0 }
 0x342   : > { %v3476_v35 = vadd.f32 %v3475_v39, %v3474_v23  ;;  %v1785_v7 = vpack.c.bf16 %v1765_v36, %v1764_v44  ;;  %v1734_v40 = vadd.f32 %v4837_v51, %v1695_v33 }
 0x343   : > { %v3477_v24 = vpop.f32.mrf.mxu0 }
 0x344   : > { %v1696_v29 = vmul.f32 %v3476_v35, %v4511_v63  ;;  %3812 = vmatmul.mubr.bf16.gmra.mxu1 %v1785_v7  ;;  %v1766_v16 = vmax.f32 %v1734_v40, 0.0 }
 0x345   : > { %v3478_v32 = vpop.f32.mrf.mxu0 }
 0x346   : > { %v1735_v22 = vadd.f32 %v4837_v51, %v1696_v29  ;;  %v3479_v42 = vadd.f32 %v3478_v32, %v3477_v24 }
 0x347   : > { %v3480_v34 = vpop.f32.mrf.mxu0 }
 0x348   : > { %v1767_v30 = vmax.f32 %v1735_v22, 0.0  ;;  %v1697_v47 = vmul.f32 %v3479_v42, %v4501_v58 }
 0x349   : > { %v3481_v43 = vpop.f32.mrf.mxu0 }
 0x34a   : > { %v3482_v48 = vadd.f32 %v3481_v43, %v3480_v34  ;;  %v1786_v46 = vpack.c.bf16 %v1767_v30, %v1766_v16  ;;  %v1736_v44 = vadd.f32 %v4837_v51, %v1697_v47 }
 0x34b   : > { %v3483_v23 = vpop.f32.mrf.mxu0 }
 0x34c   : > { %v1698_v36 = vmul.f32 %v3482_v48, %v4503_v59  ;;  %3815 = vmatprep.mubr.bf16.mxu1 %v1786_v46  ;;  %v1768_v24 = vmax.f32 %v1736_v44, 0.0 }
 0x34d   : > { %v3484_v33 = vpop.f32.mrf.mxu0 }
 0x34e   : > { %v1737_v39 = vadd.f32 %v4837_v51, %v1698_v36  ;;  %v3485_v35 = vadd.f32 %v3484_v33, %v3483_v23 }
 0x34f   : > { %v3486_v7 = vpop.f32.mrf.mxu0 }
 0x350   : > { %v1769_v29 = vmax.f32 %v1737_v39, 0.0  ;;  %v1699_v40 = vmul.f32 %v3485_v35, %v4493_v55 }
 0x351   : > { %v3487_v32 = vpop.f32.mrf.mxu0 }
 0x352   : > { %v3488_v22 = vadd.f32 %v3487_v32, %v3486_v7  ;;  %v1787_v42 = vpack.c.bf16 %v1769_v29, %v1768_v24  ;;  %v1738_v16 = vadd.f32 %v4837_v51, %v1699_v40 }
 0x353   : > { %v3489_v34 = vpop.f32.mrf.mxu0 }
 0x354   : > { %v1700_v30 = vmul.f32 %v3488_v22, %v4495_v56  ;;  %3816 = vmatmul.mubr.bf16.gmra.mxu1 %v1787_v42  ;;  %v1770_v23 = vmax.f32 %v1738_v16, 0.0  ;;  %v5609_v42 = vld [vmem:[#allocation2_spill] sm:$0xff] }
 0x355   : > { %v3490_v47 = vpop.f32.mrf.mxu0 }
 0x356   : > { %v1739_v43 = vadd.f32 %v4837_v51, %v1700_v30  ;;  %v3491_v48 = vadd.f32 %v3490_v47, %v3489_v34 }
 0x357   : > { %v3492_v46 = vpop.f32.mrf.mxu0 }
 0x358   : > { %v1771_v36 = vmax.f32 %v1739_v43, 0.0  ;;  %v1701_v44 = vmul.f32 %v3491_v48, %v4485_v41 }
 0x359   : > { %v3493_v33 = vpop.f32.mrf.mxu0 }
 0x35a   : > { %v3494_v39 = vadd.f32 %v3493_v33, %v3492_v46  ;;  %v1788_v35 = vpack.c.bf16 %v1771_v36, %v1770_v23  ;;  %v1740_v7 = vadd.f32 %v4837_v51, %v1701_v44 }
 0x35c   : > { %v1702_v24 = vmul.f32 %v3494_v39, %v4489_v53  ;;  %3819 = vmatprep.mubr.bf16.mxu1 %v1788_v35  ;;  %v1772_v40 = vmax.f32 %v1740_v7, 0.0 }
 0x35e   : > { %v1741_v29 = vadd.f32 %v4837_v51, %v1702_v24 }
 0x360   : > { %v1773_v32 = vmax.f32 %v1741_v29, 0.0 }
 0x362   : > { %v1789_v22 = vpack.c.bf16 %v1773_v32, %v1772_v40 }
 0x364   : > { %3820 = vmatmul.mubr.bf16.gmra.mxu1 %v1789_v22 }
 0x365   : > { %2095 = vmatprep.mubr.bf16.mxu1 %v5609_v42 }
 0x3b4   : > { %v3793_v34 = vpop.f32.mrf.mxu1 }
 0x3b5   : > { %v4904_v47 = vmul.f32 %v3793_v34, %v5605_v28 }
 0x3b6   : > { %v1888_v16 = vpop.f32.mrf.mxu1 }
 0x3b7   : > { %5610 = vst [vmem:[#allocation2_spill] sm:$0xff] %v4904_v47  ;;  %v4910_v46 = vmul.f32 %v1888_v16, %v4612_v25 }
 0x3b8   : > { %v3794_v30 = vpop.f32.mrf.mxu1 }
 0x3b9   : > { %v4907_v43 = vmul.f32 %v3794_v30, %v5606_v2  ;;  %5611 = vst [vmem:[#allocation42_spill] sm:$0xff] %v4910_v46 }
 0x3ba   : > { %v1891_v48 = vpop.f32.mrf.mxu1 }
 0x3bb   : > { %v4915_v23 = vmul.f32 %v1891_v48, %v4608_v49 }
 0x3bd   : > { %5612 = vst [vmem:[#allocation43_spill] sm:$0xff] %v4915_v23 }
 0x3c4   : > { %v3797_v44 = vpop.f32.mrf.mxu1 }
 0x3c5   : > { %v4920_v35 = vmul.f32 %v3797_v44, %v5607_v50 }
 0x3c6   : > { %v1904_v33 = vpop.f32.mrf.mxu1 }
 0x3c7   : > { %v4926_v29 = vmul.f32 %v1904_v33, %v4535_v12 }
 0x3c8   : > { %v3798_v39 = vpop.f32.mrf.mxu1 }
 0x3c9   : > { %v4923_v7 = vmul.f32 %v3798_v39, %v5608_v38 }
 0x3ca   : > { %v1907_v24 = vpop.f32.mrf.mxu1 }
 0x3cb   : > { %v4931_v32 = vmul.f32 %v1907_v24, %v4537_v13 }
 0x3d4   : > { %v3801_v42 = vpop.f32.mrf.mxu1 }
 0x3d6   : > { %v1920_v34 = vpop.f32.mrf.mxu1 }
 0x3d8   : > { %v3802_v16 = vpop.f32.mrf.mxu1 }
 0x3da   : > { %v1923_v30 = vpop.f32.mrf.mxu1 }
 0x3e4   : > { %v3805_v48 = vpop.f32.mrf.mxu1 }
 0x3e5   : > { %v2029_v31 = vmul.f32 %v3805_v48, %v4487_v52 }
 0x3e6   : > { %v1936_v44 = vpop.f32.mrf.mxu1 }
 0x3e8   : > { %v3806_v39 = vpop.f32.mrf.mxu1 }
 0x3e9   : > { %v2030_v20 = vmul.f32 %v3806_v39, %v4491_v54  ;;  %v2027_v39 = vmul.f32 %v1936_v44, %v4497_v57  ;;  %v5622_v44 = vld [vmem:[#allocation10_spill] sm:$0xff] }
 0x3ea   : > { %v1939_v36 = vpop.f32.mrf.mxu1 }
 0x3eb   : > { %v2054_v21 = vpack.c.bf16 %v2030_v20, %v2029_v31  ;;  %v2028_v46 = vmul.f32 %v1939_v36, %v4499_v5 }
 0x3ed   : > { %v2053_v48 = vpack.c.bf16 %v2028_v46, %v2027_v39  ;;  %v5626_v39 = vld [vmem:[#allocation17_spill] sm:$0xff] }
 0x3f4   : > { %v3809_v51 = vpop.f32.mrf.mxu1 }
 0x3f5   : > { %v2033_v36 = vmul.f32 %v3809_v51, %v4539_v14  ;;  %v4035_v51 = vld [vmem:[%s5499_s9 + $0x30] sm:$0xff]  }
 0x3f6   : > { %v1952_v33 = vpop.f32.mrf.mxu1 }
 0x3f8   : > { %v3810_v38 = vpop.f32.mrf.mxu1 }
 0x3f9   : > { %v2034_v46 = vmul.f32 %v3810_v38, %v4541_v15  ;;  %v4034_v38 = vld [vmem:[%s5499_s9 + $0x38] sm:$0xff]  }
 0x3fa   : > { %v1955_v50 = vpop.f32.mrf.mxu1  ;;  %3823 = vmatprep.subr.bf16.mxu0 %v4034_v38 }
 0x3fb   : > { %3824 = vmatpush3.bf16.msra.mxu0 %v4034_v38  ;;  %v5647_v38 = vld [vmem:[#allocation38_spill] sm:$0xff] }
 0x3fc   : > { %3825 = vmatprep.subr.bf16.mxu0 %v4035_v51 }
 0x3ff   : > { %3826 = vmatpush3.bf16.msra.mxu0 %v4035_v51  ;;  %v5648_v51 = vld [vmem:[#allocation39_spill] sm:$0xff] }
 0x404   : > { %v3813_v12 = vpop.f32.mrf.mxu1 }
 0x406   : > { %v1968_v40 = vpop.f32.mrf.mxu1 }
 0x408   : > { %v3814_v2 = vpop.f32.mrf.mxu1 }
 0x40a   : > { %v1971_v24 = vpop.f32.mrf.mxu1 }
 0x414   : > { %v3817_v13 = vpop.f32.mrf.mxu1 }
 0x416   : > { %v1984_v28 = vpop.f32.mrf.mxu1 }
 0x417   : > { %v2039_v31 = vmul.f32 %v1984_v28, %v4509_v62  ;;  %v2035_v28 = vmul.f32 %v1968_v40, %v4531_v10  ;;  %v2031_v40 = vmul.f32 %v1952_v33, %v4599_v45  ;;  %v5623_v33 = vld [vmem:[#allocation14_spill] sm:$0xff] }
 0x418   : > { %v3818_v49 = vpop.f32.mrf.mxu1 }
 0x419   : > { %v2042_v23 = vmul.f32 %v3818_v49, %v4503_v59 }
 0x41a   : > { %v1987_v22 = vpop.f32.mrf.mxu1 }
 0x424   : > { %v3821_v25 = vpop.f32.mrf.mxu1 }
 0x425   : > { %v2045_v8 = vmul.f32 %v3821_v25, %v4485_v41  ;;  %v2041_v25 = vmul.f32 %v3817_v13, %v4501_v58  ;;  %v2023_v13 = vmul.f32 %v1920_v34, %v4518_v1 }
 0x426   : > { %v2000_v18 = vpop.f32.mrf.mxu1 }
 0x427   : > { %v2043_v26 = vmul.f32 %v2000_v18, %v4493_v55  ;;  %v2060_v18 = vpack.c.bf16 %v2042_v23, %v2041_v25  ;;  %v5627_v25 = vld [vmem:[#allocation18_spill] sm:$0xff] }
 0x428   : > { %v3822_v19 = vpop.f32.mrf.mxu1 }
 0x429   : > { %v2046_v9 = vmul.f32 %v3822_v19, %v4489_v53  ;;  %v2026_v19 = vmul.f32 %v3802_v16, %v4507_v61  ;;  %v5620_v16 = vld [vmem:[#allocation7_spill] sm:$0xff] }
 0x42a   : > { %v2003_v0 = vpop.f32.mrf.mxu1 }
 0x42b   : > { %v2062_v17 = vpack.c.bf16 %v2046_v9, %v2045_v8  ;;  %v2044_v27 = vmul.f32 %v2003_v0, %v4495_v56  ;;  %v2040_v9 = vmul.f32 %v1987_v22, %v4511_v63  ;;  %v2025_v0 = vmul.f32 %v3801_v42, %v4505_v60 }
 0x42c   : > { %v2032_v22 = vmul.f32 %v1955_v50, %v4594_v37  ;;  %v5614_v42 = vpack.c.bf16 %v4931_v32, %v4926_v29  ;;  %v5617_v50 = vld [vmem:[#allocation43_spill] sm:$0xff]  ;;  %v5618_v29 = vld [vmem:[#allocation42_spill] sm:$0xff] }
 0x42d   : > { %v2061_v47 = vpack.c.bf16 %v2044_v27, %v2043_v26  ;;  %3519 = vmatprep.subr.bf16.mxu1 %v2062_v17  ;;  %v2052_v49 = vpack.c.bf16 %v2026_v19, %v2025_v0  ;;  %v2024_v27 = vmul.f32 %v1923_v30, %v4520_v3  ;;  %v2059_v17 = vpack.c.bf16 %v2040_v9, %v2039_v31  ;;  %v5621_v30 = vld [vmem:[#allocation11_spill] sm:$0xff]  ;;  %v5631_v9 = vld [vmem:[#allocation22_spill] sm:$0xff]  ;;  %v5633_v31 = vld [vmem:[#allocation24_spill] sm:$0xff] }
 0x42e   : > { %3520 = vmatpush3.bf16.msra.mxu1 %v2054_v21  ;;  %v2038_v21 = vmul.f32 %v3814_v2, %v4525_v6  ;;  %v2037_v26 = vmul.f32 %v3813_v12, %v4523_v4  ;;  %v5613_v2 = vpack.c.bf16 %v4923_v7, %v4920_v35  ;;  %v2056_v12 = vpack.c.bf16 %v2034_v46, %v2033_v36  ;;  %v5615_v35 = vld [vmem:[#allocation2_spill] sm:$0xff]  ;;  %v5628_v19 = vld [vmem:[#allocation19_spill] sm:$0xff] }
 0x42f   : > { %3521 = vmatprep.subr.bf16.mxu1 %v2061_v47  ;;  %v2051_v8 = vpack.c.bf16 %v2024_v27, %v2023_v13  ;;  %v2036_v47 = vmul.f32 %v1971_v24, %v4533_v11  ;;  %v2055_v34 = vpack.c.bf16 %v2032_v22, %v2031_v40  ;;  %v5616_v7 = vpack.c.bf16 %v4907_v43, %v5615_v35  ;;  %v5624_v24 = vld [vmem:[#allocation15_spill] sm:$0xff]  ;;  %v5625_v43 = vld [vmem:[#allocation16_spill] sm:$0xff]  ;;  %v5635_v27 = vld [vmem:[#allocation26_spill] sm:$0xff] }
 0x430   : > { %v2058_v20 = vpack.c.bf16 %v2038_v21, %v2037_v26  ;;  %v5619_v32 = vpack.c.bf16 %v5617_v50, %v5618_v29  ;;  %v5632_v0 = vld [vmem:[#allocation23_spill] sm:$0xff]  ;;  %v5637_v13 = vld [vmem:[#allocation28_spill] sm:$0xff]  ;;  %v4037_v26 = vld [vmem:[%s5499_s9 + $0x20] sm:$0xff]  }
 0x431   : > { %v2057_v23 = vpack.c.bf16 %v2036_v47, %v2035_v28  ;;  %v4036_v21 = vld [vmem:[%s5499_s9 + $0x28] sm:$0xff]   ;;  %v5639_v47 = vld [vmem:[#allocation30_spill] sm:$0xff]  ;;  %v4039_v28 = vld [vmem:[%s5499_s9 + $0x10] sm:$0xff]  }
 0x432   : > { %3522 = vmatpush3.bf16.msra.mxu1 %v2053_v48  ;;  %v5629_v48 = vld [vmem:[#allocation20_spill] sm:$0xff]  ;;  %3827 = vmatprep.subr.bf16.mxu0 %v4036_v21  ;;  %v4040_v46 = vld [vmem:[%s5499_s9 + $0x8] sm:$0xff]   ;;  %v4041_v36 = vld [vmem:[%s5499_s9] sm:$0xff]  }
 0x433   : > { %3523 = vmatprep.subr.bf16.mxu1 %v2060_v18  ;;  %v5630_v18 = vld [vmem:[#allocation21_spill] sm:$0xff]  ;;  %3828 = vmatpush3.bf16.msra.mxu0 %v4036_v21  ;;  %v5643_v22 = vld [vmem:[#allocation34_spill] sm:$0xff]  ;;  %v5645_v40 = vld [vmem:[#allocation36_spill] sm:$0xff] }
 0x434   : > { %3829 = vmatprep.subr.bf16.mxu0 %v4037_v26  ;;  %v5649_v35 = vld [vmem:[#allocation40_spill] sm:$0xff] }
 0x436   : > { %3524 = vmatpush3.bf16.msra.mxu1 %v2052_v49  ;;  %v5634_v49 = vld [vmem:[#allocation25_spill] sm:$0xff] }
 0x437   : > { %3525 = vmatprep.subr.bf16.mxu1 %v2059_v17  ;;  %v5636_v17 = vld [vmem:[#allocation27_spill] sm:$0xff]  ;;  %3830 = vmatpush3.bf16.msra.mxu0 %v4037_v26 }
 0x43a   : > { %3526 = vmatpush3.bf16.msra.mxu1 %v2051_v8  ;;  %v4038_v8 = vld [vmem:[%s5499_s9 + $0x18] sm:$0xff]  }
 0x43b   : > { %3527 = vmatprep.subr.bf16.mxu1 %v2058_v20  ;;  %v5638_v20 = vld [vmem:[#allocation29_spill] sm:$0xff]  ;;  %3831 = vmatprep.subr.bf16.mxu0 %v4038_v8 }
 0x43c   : > { %3832 = vmatpush3.bf16.msra.mxu0 %v4038_v8 }
 0x43d   : > { %3833 = vmatprep.subr.bf16.mxu0 %v4039_v28 }
 0x43e   : > { %3528 = vmatpush3.bf16.msra.mxu1 %v5613_v2  ;;  %v5641_v2 = vld [vmem:[#allocation32_spill] sm:$0xff] }
 0x43f   : > { %3529 = vmatprep.subr.bf16.mxu1 %v2057_v23  ;;  %v5640_v23 = vld [vmem:[#allocation31_spill] sm:$0xff] }
 0x440   : > { %3834 = vmatpush3.bf16.msra.mxu0 %v4039_v28 }
 0x441   : > { %3835 = vmatprep.subr.bf16.mxu0 %v4040_v46 }
 0x442   : > { %3530 = vmatpush3.bf16.msra.mxu1 %v5614_v42  ;;  %v5644_v42 = vld [vmem:[#allocation35_spill] sm:$0xff] }
 0x443   : > { %3531 = vmatprep.subr.bf16.mxu1 %v2056_v12  ;;  %v5642_v12 = vld [vmem:[#allocation33_spill] sm:$0xff] }
 0x444   : > { %3836 = vmatpush3.bf16.msra.mxu0 %v4040_v46  ;;  %v5654_v46 = vld [vmem:[#allocation9_spill] sm:$0xff] }
 0x445   : > { %3837 = vmatprep.subr.bf16.mxu0 %v4041_v36 }
 0x446   : > { %3532 = vmatpush3.bf16.msra.mxu1 %v5616_v7  ;;  %v5650_v7 = vld [vmem:[#allocation41_spill] sm:$0xff] }
 0x447   : > { %3533 = vmatprep.subr.bf16.mxu1 %v2055_v34  ;;  %v5646_v34 = vld [vmem:[#allocation37_spill] sm:$0xff] }
 0x448   : > { %3838 = vmatpush3.bf16.msra.mxu0 %v4041_v36 }
 0x44a   : > { %3534 = vmatpush3.bf16.msra.mxu1 %v5619_v32 }
 0x44d   : > { %2096 = vmatmul.mubr.bf16.vlgmr.msra.gmra.mxu1 %v5620_v16 }
 0x44e   : > { %2103 = vmatprep.mubr.bf16.mxu1 %v5621_v30  ;;  %v5651_v30 = vld [vmem:[#allocation13_spill] sm:$0xff] }
 0x455   : > { %2104 = vmatmul.mubr.bf16.gmra.mxu1 %v5622_v44 }
 0x456   : > { %2111 = vmatprep.mubr.bf16.mxu1 %v5623_v33  ;;  %v5030_v33 = vld [vmem:[%s5498_s8] ss:$0 sm:$0xff] }
 0x45d   : > { %2112 = vmatmul.mubr.bf16.gmra.mxu1 %v5624_v24 }
 0x45e   : > { %2119 = vmatprep.mubr.bf16.mxu1 %v5625_v43 }
 0x465   : > { %2120 = vmatmul.mubr.bf16.gmra.mxu1 %v5626_v39 }
 0x466   : > { %2127 = vmatprep.mubr.bf16.mxu1 %v5627_v25 }
 0x46d   : > { %2128 = vmatmul.mubr.bf16.gmra.mxu1 %v5628_v19  ;;  %v5652_v19 = vld [vmem:[#allocation12_spill] sm:$0xff] }
 0x46e   : > { %2135 = vmatprep.mubr.bf16.mxu1 %v5629_v48 }
 0x475   : > { %2136 = vmatmul.mubr.bf16.gmra.mxu1 %v5630_v18  ;;  %v4042_v18 = vld [vmem:[%s5501_s11 + $0x38] sm:$0xff]  }
 0x476   : > { %2143 = vmatprep.mubr.bf16.mxu1 %v5631_v9  ;;  %3871 = vmatprep.subr.bf16.mxu0 %v4042_v18 }
 0x47d   : > { %2144 = vmatmul.mubr.bf16.gmra.mxu1 %v5632_v0 }
 0x47e   : > { %2151 = vmatprep.mubr.bf16.mxu1 %v5633_v31 }
 0x485   : > { %2152 = vmatmul.mubr.bf16.gmra.mxu1 %v5634_v49 }
 0x486   : > { %2159 = vmatprep.mubr.bf16.mxu1 %v5635_v27 }
 0x48d   : > { %2160 = vmatmul.mubr.bf16.gmra.mxu1 %v5636_v17  ;;  %v5653_v17 = vld [vmem:[#allocation8_spill] sm:$0xff] }
 0x48e   : > { %2167 = vmatprep.mubr.bf16.mxu1 %v5637_v13 }
 0x495   : > { %2168 = vmatmul.mubr.bf16.gmra.mxu1 %v5638_v20 }
 0x496   : > { %2175 = vmatprep.mubr.bf16.mxu1 %v5639_v47 }
 0x49d   : > { %2176 = vmatmul.mubr.bf16.gmra.mxu1 %v5640_v23 }
 0x49e   : > { %2183 = vmatprep.mubr.bf16.mxu1 %v5641_v2 }
 0x4a5   : > { %2184 = vmatmul.mubr.bf16.gmra.mxu1 %v5642_v12 }
 0x4a6   : > { %2191 = vmatprep.mubr.bf16.mxu1 %v5643_v22 }
 0x4ad   : > { %2192 = vmatmul.mubr.bf16.gmra.mxu1 %v5644_v42 }
 0x4ae   : > { %2199 = vmatprep.mubr.bf16.mxu1 %v5645_v40 }
 0x4b5   : > { %2200 = vmatmul.mubr.bf16.gmra.mxu1 %v5646_v34  ;;  %v5655_v34 = vld [vmem:[#allocation5_spill] sm:$0xff] }
 0x4b6   : > { %2207 = vmatprep.mubr.bf16.mxu1 %v5647_v38 }
 0x4bd   : > { %2208 = vmatmul.mubr.bf16.gmra.mxu1 %v5648_v51 }
 0x4be   : > { %2215 = vmatprep.mubr.bf16.mxu1 %v5649_v35 }
 0x4c5   : > { %2216 = vmatmul.mubr.bf16.gmra.mxu1 %v5650_v7 }
 0x50d   : > { %v3535_v50 = vpop.f32.mrf.mxu1 }
 0x50f   : > { %v3536_v29 = vpop.f32.mrf.mxu1 }
 0x510   : > { %v3537_v32 = vadd.f32 %v3536_v29, %v3535_v50  ;;  %v4043_v50 = vld [vmem:[%s5501_s11 + $0x30] sm:$0xff]  }
 0x511   : > { %v3538_v16 = vpop.f32.mrf.mxu1 }
 0x512   : > { %v2224_v44 = vmul.f32 %v3537_v32, %v5651_v30 }
 0x513   : > { %v3539_v24 = vpop.f32.mrf.mxu1 }
 0x514   : > { %v3540_v43 = vadd.f32 %v3539_v24, %v3538_v16  ;;  %v2263_v25 = vadd.f32 %v5030_v33, %v2224_v44  ;;  %v5656_v16 = vld [vmem:[#allocation6_spill] sm:$0xff] }
 0x515   : > { %v3541_v39 = vpop.f32.mrf.mxu1 }
 0x516   : > { %v2225_v48 = vmul.f32 %v3540_v43, %v5652_v19  ;;  %v2295_v27 = vmax.f32 %v2263_v25, 0.0 }
 0x517   : > { %v3542_v9 = vpop.f32.mrf.mxu1 }
 0x518   : > { %v2264_v0 = vadd.f32 %v5030_v33, %v2225_v48  ;;  %v3543_v31 = vadd.f32 %v3542_v9, %v3541_v39  ;;  %v4044_v39 = vld [vmem:[%s5501_s11 + $0x28] sm:$0xff]  }
 0x519   : > { %v3544_v49 = vpop.f32.mrf.mxu1  ;;  %v5657_v9 = vld [vmem:[#allocation3_spill] sm:$0xff] }
 0x51a   : > { %v2296_v21 = vmax.f32 %v2264_v0, 0.0  ;;  %v2226_v13 = vmul.f32 %v3543_v31, %v5653_v17 }
 0x51b   : > { %v3545_v26 = vpop.f32.mrf.mxu1 }
 0x51c   : > { %v3546_v8 = vadd.f32 %v3545_v26, %v3544_v49  ;;  %v2327_v20 = vpack.c.bf16 %v2296_v21, %v2295_v27  ;;  %v2265_v28 = vadd.f32 %v5030_v33, %v2226_v13  ;;  %v5658_v13 = vld [vmem:[#allocation4_spill] sm:$0xff] }
 0x51d   : > { %v3547_v47 = vpop.f32.mrf.mxu1 }
 0x51e   : > { %v2227_v23 = vmul.f32 %v3546_v8, %v5654_v46  ;;  %3839 = vmatprep.mubr.bf16.mxu0 %v2327_v20  ;;  %v2297_v42 = vmax.f32 %v2265_v28, 0.0  ;;  %v4046_v28 = vld [vmem:[%s5501_s11 + $0x18] sm:$0xff]  }
 0x51f   : > { %v3548_v2 = vpop.f32.mrf.mxu1 }
 0x520   : > { %v2266_v36 = vadd.f32 %v5030_v33, %v2227_v23  ;;  %v3549_v12 = vadd.f32 %v3548_v2, %v3547_v47 }
 0x521   : > { %v3550_v22 = vpop.f32.mrf.mxu1 }
 0x522   : > { %v2298_v40 = vmax.f32 %v2266_v36, 0.0  ;;  %v2228_v38 = vmul.f32 %v3549_v12, %v5655_v34 }
 0x523   : > { %v3551_v51 = vpop.f32.mrf.mxu1 }
 0x524   : > { %v2328_v35 = vpack.c.bf16 %v2298_v40, %v2297_v42  ;;  %v3552_v7 = vadd.f32 %v3551_v51, %v3550_v22  ;;  %v2267_v32 = vadd.f32 %v5030_v33, %v2228_v38 }
 0x525   : > { %v3553_v29 = vpop.f32.mrf.mxu1 }
 0x526   : > { %v2229_v30 = vmul.f32 %v3552_v7, %v5656_v16  ;;  %3840 = vmatmul.mubr.bf16.vlgmr.msra.gmra.mxu0 %v2328_v35  ;;  %v2299_v19 = vmax.f32 %v2267_v32, 0.0 }
 0x527   : > { %v3554_v44 = vpop.f32.mrf.mxu1  ;;  %3872 = vmatpush3.bf16.msra.mxu0 %v4042_v18  ;;  %v4045_v18 = vld [vmem:[%s5501_s11 + $0x20] sm:$0xff]  }
 0x528   : > { %v2268_v24 = vadd.f32 %v5030_v33, %v2229_v30  ;;  %v3555_v43 = vadd.f32 %v3554_v44, %v3553_v29  ;;  %3873 = vmatprep.subr.bf16.mxu0 %v4043_v50 }
 0x529   : > { %v3556_v25 = vpop.f32.mrf.mxu1 }
 0x52a   : > { %v2300_v48 = vmax.f32 %v2268_v24, 0.0  ;;  %v2230_v0 = vmul.f32 %v3555_v43, %v5657_v9 }
 0x52b   : > { %v3557_v31 = vpop.f32.mrf.mxu1  ;;  %3874 = vmatpush3.bf16.msra.mxu0 %v4043_v50 }
 0x52c   : > { %v3558_v49 = vadd.f32 %v3557_v31, %v3556_v25  ;;  %v2329_v27 = vpack.c.bf16 %v2300_v48, %v2299_v19  ;;  %3875 = vmatprep.subr.bf16.mxu0 %v4044_v39  ;;  %v2269_v17 = vadd.f32 %v5030_v33, %v2230_v0 }
 0x52d   : > { %v3559_v21 = vpop.f32.mrf.mxu1 }
 0x52e   : > { %v2231_v26 = vmul.f32 %v3558_v49, %v5658_v13  ;;  %3843 = vmatprep.mubr.bf16.mxu0 %v2329_v27  ;;  %v2301_v23 = vmax.f32 %v2269_v17, 0.0 }
 0x52f   : > { %v3560_v8 = vpop.f32.mrf.mxu1  ;;  %3876 = vmatpush3.bf16.msra.mxu0 %v4044_v39 }
 0x530   : > { %v2270_v20 = vadd.f32 %v5030_v33, %v2231_v26  ;;  %v3561_v47 = vadd.f32 %v3560_v8, %v3559_v21  ;;  %3877 = vmatprep.subr.bf16.mxu0 %v4045_v18 }
 0x531   : > { %v3562_v46 = vpop.f32.mrf.mxu1 }
 0x532   : > { %v2302_v2 = vmax.f32 %v2270_v20, 0.0  ;;  %v2232_v36 = vmul.f32 %v3561_v47, %v4518_v1 }
 0x533   : > { %v3563_v12 = vpop.f32.mrf.mxu1  ;;  %3878 = vmatpush3.bf16.msra.mxu0 %v4045_v18 }
 0x534   : > { %v3564_v22 = vadd.f32 %v3563_v12, %v3562_v46  ;;  %v2330_v42 = vpack.c.bf16 %v2302_v2, %v2301_v23  ;;  %3879 = vmatprep.subr.bf16.mxu0 %v4046_v28  ;;  %v2271_v34 = vadd.f32 %v5030_v33, %v2232_v36 }
 0x535   : > { %v3565_v40 = vpop.f32.mrf.mxu1 }
 0x536   : > { %v2233_v38 = vmul.f32 %v3564_v22, %v4520_v3  ;;  %3844 = vmatmul.mubr.bf16.gmra.mxu0 %v2330_v42  ;;  %v2303_v29 = vmax.f32 %v2271_v34, 0.0 }
 0x537   : > { %v3566_v51 = vpop.f32.mrf.mxu1  ;;  %3880 = vmatpush3.bf16.msra.mxu0 %v4046_v28 }
 0x538   : > { %v2272_v35 = vadd.f32 %v5030_v33, %v2233_v38  ;;  %v3567_v7 = vadd.f32 %v3566_v51, %v3565_v40 }
 0x539   : > { %v3568_v50 = vpop.f32.mrf.mxu1 }
 0x53a   : > { %v2304_v32 = vmax.f32 %v2272_v35, 0.0  ;;  %v2234_v1 = vmul.f32 %v3567_v7, %v4505_v60 }
 0x53b   : > { %v3569_v16 = vpop.f32.mrf.mxu1 }
 0x53c   : > { %v3570_v30 = vadd.f32 %v3569_v16, %v3568_v50  ;;  %v2331_v44 = vpack.c.bf16 %v2304_v32, %v2303_v29  ;;  %v2273_v43 = vadd.f32 %v5030_v33, %v2234_v1 }
 0x53d   : > { %v3571_v24 = vpop.f32.mrf.mxu1 }
 0x53e   : > { %v2235_v39 = vmul.f32 %v3570_v30, %v4507_v61  ;;  %3847 = vmatprep.mubr.bf16.mxu0 %v2331_v44  ;;  %v2305_v9 = vmax.f32 %v2273_v43, 0.0 }
 0x53f   : > { %v3572_v3 = vpop.f32.mrf.mxu1 }
 0x540   : > { %v2274_v25 = vadd.f32 %v5030_v33, %v2235_v39  ;;  %v3573_v19 = vadd.f32 %v3572_v3, %v3571_v24 }
 0x541   : > { %v3574_v48 = vpop.f32.mrf.mxu1 }
 0x542   : > { %v2306_v0 = vmax.f32 %v2274_v25, 0.0  ;;  %v2236_v31 = vmul.f32 %v3573_v19, %v4497_v57 }
 0x543   : > { %v3575_v49 = vpop.f32.mrf.mxu1 }
 0x544   : > { %v3576_v60 = vadd.f32 %v3575_v49, %v3574_v48  ;;  %v2332_v27 = vpack.c.bf16 %v2306_v0, %v2305_v9  ;;  %v2275_v21 = vadd.f32 %v5030_v33, %v2236_v31 }
 0x545   : > { %v3577_v18 = vpop.f32.mrf.mxu1 }
 0x546   : > { %v2237_v17 = vmul.f32 %v3576_v60, %v4499_v5  ;;  %3848 = vmatmul.mubr.bf16.gmra.mxu0 %v2332_v27  ;;  %v2307_v20 = vmax.f32 %v2275_v21, 0.0 }
 0x547   : > { %v3578_v61 = vpop.f32.mrf.mxu1 }
 0x548   : > { %v2276_v13 = vadd.f32 %v5030_v33, %v2237_v17  ;;  %v3579_v26 = vadd.f32 %v3578_v61, %v3577_v18 }
 0x549   : > { %v3580_v8 = vpop.f32.mrf.mxu1 }
 0x54a   : > { %v2308_v47 = vmax.f32 %v2276_v13, 0.0  ;;  %v2238_v28 = vmul.f32 %v3579_v26, %v4487_v52 }
 0x54b   : > { %v3581_v46 = vpop.f32.mrf.mxu1 }
 0x54c   : > { %v3582_v57 = vadd.f32 %v3581_v46, %v3580_v8  ;;  %v2333_v23 = vpack.c.bf16 %v2308_v47, %v2307_v20  ;;  %v2277_v36 = vadd.f32 %v5030_v33, %v2238_v28 }
 0x54d   : > { %v3583_v2 = vpop.f32.mrf.mxu1 }
 0x54e   : > { %v2239_v12 = vmul.f32 %v3582_v57, %v4491_v54  ;;  %3851 = vmatprep.mubr.bf16.mxu0 %v2333_v23  ;;  %v2309_v34 = vmax.f32 %v2277_v36, 0.0 }
 0x54f   : > { %v3584_v5 = vpop.f32.mrf.mxu1 }
 0x550   : > { %v2278_v22 = vadd.f32 %v5030_v33, %v2239_v12  ;;  %v3585_v42 = vadd.f32 %v3584_v5, %v3583_v2 }
 0x551   : > { %v3586_v40 = vpop.f32.mrf.mxu1 }
 0x552   : > { %v2310_v38 = vmax.f32 %v2278_v22, 0.0  ;;  %v2240_v51 = vmul.f32 %v3585_v42, %v4599_v45  ;;  %v4049_v22 = vld [vmem:[%s5501_s11] sm:$0xff]  }
 0x553   : > { %v3587_v35 = vpop.f32.mrf.mxu1 }
 0x554   : > { %v3588_v52 = vadd.f32 %v3587_v35, %v3586_v40  ;;  %v2334_v7 = vpack.c.bf16 %v2310_v38, %v2309_v34  ;;  %v2279_v29 = vadd.f32 %v5030_v33, %v2240_v51 }
 0x555   : > { %v3589_v50 = vpop.f32.mrf.mxu1 }
 0x556   : > { %v2241_v32 = vmul.f32 %v3588_v52, %v4594_v37  ;;  %3852 = vmatmul.mubr.bf16.gmra.mxu0 %v2334_v7  ;;  %v2311_v44 = vmax.f32 %v2279_v29, 0.0 }
 0x557   : > { %v3590_v54 = vpop.f32.mrf.mxu1 }
 0x558   : > { %v2280_v1 = vadd.f32 %v5030_v33, %v2241_v32  ;;  %v3591_v16 = vadd.f32 %v3590_v54, %v3589_v50 }
 0x559   : > { %v3592_v30 = vpop.f32.mrf.mxu1 }
 0x55a   : > { %v2312_v24 = vmax.f32 %v2280_v1, 0.0  ;;  %v2242_v43 = vmul.f32 %v3591_v16, %v4539_v14 }
 0x55b   : > { %v3593_v39 = vpop.f32.mrf.mxu1 }
 0x55c   : > { %v3594_v45 = vadd.f32 %v3593_v39, %v3592_v30  ;;  %v2335_v3 = vpack.c.bf16 %v2312_v24, %v2311_v44  ;;  %v2281_v19 = vadd.f32 %v5030_v33, %v2242_v43 }
 0x55d   : > { %v3595_v25 = vpop.f32.mrf.mxu1 }
 0x55e   : > { %v2243_v48 = vmul.f32 %v3594_v45, %v4541_v15  ;;  %3855 = vmatprep.mubr.bf16.mxu0 %v2335_v3  ;;  %v2313_v49 = vmax.f32 %v2281_v19, 0.0  ;;  %v4047_v15 = vld [vmem:[%s5501_s11 + $0x10] sm:$0xff]  }
 0x55f   : > { %v3596_v37 = vpop.f32.mrf.mxu1  ;;  %3881 = vmatprep.subr.bf16.mxu0 %v4047_v15 }
 0x560   : > { %v2282_v9 = vadd.f32 %v5030_v33, %v2243_v48  ;;  %v3597_v0 = vadd.f32 %v3596_v37, %v3595_v25  ;;  %3882 = vmatpush3.bf16.msra.mxu0 %v4047_v15 }
 0x561   : > { %v3598_v31 = vpop.f32.mrf.mxu1 }
 0x562   : > { %v2314_v60 = vmax.f32 %v2282_v9, 0.0  ;;  %v2244_v27 = vmul.f32 %v3597_v0, %v4531_v10 }
 0x563   : > { %v3599_v18 = vpop.f32.mrf.mxu1 }
 0x564   : > { %v3600_v14 = vadd.f32 %v3599_v18, %v3598_v31  ;;  %v2336_v21 = vpack.c.bf16 %v2314_v60, %v2313_v49  ;;  %v2283_v61 = vadd.f32 %v5030_v33, %v2244_v27 }
 0x565   : > { %v3601_v17 = vpop.f32.mrf.mxu1 }
 0x566   : > { %v2245_v13 = vmul.f32 %v3600_v14, %v4533_v11  ;;  %3856 = vmatmul.mubr.bf16.gmra.mxu0 %v2336_v21  ;;  %v2315_v10 = vmax.f32 %v2283_v61, 0.0  ;;  %v4048_v11 = vld [vmem:[%s5501_s11 + $0x8] sm:$0xff]  }
 0x567   : > { %v3602_v26 = vpop.f32.mrf.mxu1  ;;  %3883 = vmatprep.subr.bf16.mxu0 %v4048_v11 }
 0x568   : > { %v2284_v8 = vadd.f32 %v5030_v33, %v2245_v13  ;;  %v3603_v20 = vadd.f32 %v3602_v26, %v3601_v17  ;;  %3884 = vmatpush3.bf16.msra.mxu0 %v4048_v11 }
 0x569   : > { %v3604_v47 = vpop.f32.mrf.mxu1  ;;  %3885 = vmatprep.subr.bf16.mxu0 %v4049_v22 }
 0x56a   : > { %v2316_v28 = vmax.f32 %v2284_v8, 0.0  ;;  %v2246_v46 = vmul.f32 %v3603_v20, %v4523_v4 }
 0x56b   : > { %v3605_v57 = vpop.f32.mrf.mxu1 }
 0x56c   : > { %v3606_v23 = vadd.f32 %v3605_v57, %v3604_v47  ;;  %v2337_v2 = vpack.c.bf16 %v2316_v28, %v2315_v10  ;;  %v2285_v12 = vadd.f32 %v5030_v33, %v2246_v46  ;;  %3886 = vmatpush3.bf16.msra.mxu0 %v4049_v22 }
 0x56d   : > { %v3607_v36 = vpop.f32.mrf.mxu1 }
 0x56e   : > { %v2247_v5 = vmul.f32 %v3606_v23, %v4525_v6  ;;  %3859 = vmatprep.mubr.bf16.mxu0 %v2337_v2  ;;  %v2317_v38 = vmax.f32 %v2285_v12, 0.0 }
 0x56f   : > { %v3608_v4 = vpop.f32.mrf.mxu1 }
 0x570   : > { %v2286_v42 = vadd.f32 %v5030_v33, %v2247_v5  ;;  %v3609_v40 = vadd.f32 %v3608_v4, %v3607_v36 }
 0x571   : > { %v3610_v34 = vpop.f32.mrf.mxu1 }
 0x572   : > { %v2318_v51 = vmax.f32 %v2286_v42, 0.0  ;;  %v2248_v35 = vmul.f32 %v3609_v40, %v4509_v62 }
 0x573   : > { %v3611_v52 = vpop.f32.mrf.mxu1 }
 0x574   : > { %v3612_v7 = vadd.f32 %v3611_v52, %v3610_v34  ;;  %v2338_v50 = vpack.c.bf16 %v2318_v51, %v2317_v38  ;;  %v2287_v29 = vadd.f32 %v5030_v33, %v2248_v35 }
 0x575   : > { %v3613_v6 = vpop.f32.mrf.mxu1 }
 0x576   : > { %v2249_v32 = vmul.f32 %v3612_v7, %v4511_v63  ;;  %3860 = vmatmul.mubr.bf16.gmra.mxu0 %v2338_v50  ;;  %v2319_v44 = vmax.f32 %v2287_v29, 0.0 }
 0x577   : > { %v3614_v54 = vpop.f32.mrf.mxu1 }
 0x578   : > { %v2288_v1 = vadd.f32 %v5030_v33, %v2249_v32  ;;  %v3615_v16 = vadd.f32 %v3614_v54, %v3613_v6 }
 0x579   : > { %v3616_v30 = vpop.f32.mrf.mxu1 }
 0x57a   : > { %v2320_v24 = vmax.f32 %v2288_v1, 0.0  ;;  %v2250_v43 = vmul.f32 %v3615_v16, %v4501_v58 }
 0x57b   : > { %v3617_v39 = vpop.f32.mrf.mxu1 }
 0x57c   : > { %v3618_v62 = vadd.f32 %v3617_v39, %v3616_v30  ;;  %v2339_v45 = vpack.c.bf16 %v2320_v24, %v2319_v44  ;;  %v2289_v25 = vadd.f32 %v5030_v33, %v2250_v43 }
 0x57d   : > { %v3619_v3 = vpop.f32.mrf.mxu1 }
 0x57e   : > { %v2251_v19 = vmul.f32 %v3618_v62, %v4503_v59  ;;  %3863 = vmatprep.mubr.bf16.mxu0 %v2339_v45  ;;  %v2321_v0 = vmax.f32 %v2289_v25, 0.0 }
 0x57f   : > { %v3620_v63 = vpop.f32.mrf.mxu1 }
 0x580   : > { %v2290_v48 = vadd.f32 %v5030_v33, %v2251_v19  ;;  %v3621_v37 = vadd.f32 %v3620_v63, %v3619_v3 }
 0x581   : > { %v3622_v9 = vpop.f32.mrf.mxu1 }
 0x582   : > { %v2322_v31 = vmax.f32 %v2290_v48, 0.0  ;;  %v2252_v49 = vmul.f32 %v3621_v37, %v4493_v55 }
 0x583   : > { %v3623_v60 = vpop.f32.mrf.mxu1 }
 0x584   : > { %v3624_v58 = vadd.f32 %v3623_v60, %v3622_v9  ;;  %v2340_v27 = vpack.c.bf16 %v2322_v31, %v2321_v0  ;;  %v2291_v14 = vadd.f32 %v5030_v33, %v2252_v49 }
 0x585   : > { %v3625_v18 = vpop.f32.mrf.mxu1 }
 0x586   : > { %v2253_v21 = vmul.f32 %v3624_v58, %v4495_v56  ;;  %3864 = vmatmul.mubr.bf16.gmra.mxu0 %v2340_v27  ;;  %v2323_v15 = vmax.f32 %v2291_v14, 0.0 }
 0x587   : > { %v3626_v59 = vpop.f32.mrf.mxu1 }
 0x588   : > { %v2292_v17 = vadd.f32 %v5030_v33, %v2253_v21  ;;  %v3627_v61 = vadd.f32 %v3626_v59, %v3625_v18 }
 0x589   : > { %v3628_v13 = vpop.f32.mrf.mxu1 }
 0x58a   : > { %v2324_v26 = vmax.f32 %v2292_v17, 0.0  ;;  %v2254_v8 = vmul.f32 %v3627_v61, %v4485_v41  ;;  %v5122_v41 = vld [vmem:[%s5500_s10] ss:$0 sm:$0xff] }
 0x58b   : > { %v3629_v20 = vpop.f32.mrf.mxu1 }
 0x58c   : > { %v3630_v55 = vadd.f32 %v3629_v20, %v3628_v13  ;;  %v2341_v47 = vpack.c.bf16 %v2324_v26, %v2323_v15  ;;  %v2293_v10 = vadd.f32 %v5030_v33, %v2254_v8 }
 0x58e   : > { %v2255_v28 = vmul.f32 %v3630_v55, %v4489_v53  ;;  %3867 = vmatprep.mubr.bf16.mxu0 %v2341_v47  ;;  %v2325_v46 = vmax.f32 %v2293_v10, 0.0 }
 0x590   : > { %v2294_v56 = vadd.f32 %v5030_v33, %v2255_v28 }
 0x592   : > { %v2326_v11 = vmax.f32 %v2294_v56, 0.0 }
 0x594   : > { %v2342_v57 = vpack.c.bf16 %v2326_v11, %v2325_v46 }
 0x596   : > { %3868 = vmatmul.mubr.bf16.gmra.mxu0 %v2342_v57 }
 0x5e6   : > { %v3841_v23 = vpop.f32.mrf.mxu0 }
 0x5e7   : > { %v2457_v53 = vadd.f32 %v3841_v23, %v5122_v41 }
 0x5e8   : > { %v2448_v2 = vpop.f32.mrf.mxu0 }
 0x5e9   : > { %v2449_v12 = vadd.f32 %v5122_v41, %v2448_v2  ;;  %v2577_v34 = vmax.f32 %v2457_v53, 0.0 }
 0x5ea   : > { %v3842_v36 = vpop.f32.mrf.mxu0 }
 0x5eb   : > { %v2460_v5 = vadd.f32 %v3842_v36, %v5122_v41  ;;  %v2575_v42 = vmax.f32 %v2449_v12, 0.0 }
 0x5ec   : > { %v2451_v22 = vpop.f32.mrf.mxu0 }
 0x5ed   : > { %v2452_v33 = vadd.f32 %v5122_v41, %v2451_v22  ;;  %v2578_v4 = vmax.f32 %v2460_v5, 0.0 }
 0x5ef   : > { %v2576_v40 = vmax.f32 %v2452_v33, 0.0  ;;  %v2608_v51 = vpack.c.bf16 %v2578_v4, %v2577_v34 }
 0x5f1   : > { %v2607_v38 = vpack.c.bf16 %v2576_v40, %v2575_v42 }
 0x5f3   : > { %3887 = vmatprep.mubr.bf16.mxu0 %v2607_v38 }
 0x5f4   : > { %3888 = vmatmul.mubr.bf16.vlgmr.msra.gmra.mxu0 %v2608_v51 }
 0x5f6   : > { %v3845_v35 = vpop.f32.mrf.mxu0 }
 0x5f7   : > { %v2473_v29 = vadd.f32 %v3845_v35, %v5122_v41 }
 0x5f8   : > { %v2464_v52 = vpop.f32.mrf.mxu0 }
 0x5f9   : > { %v2465_v50 = vadd.f32 %v5122_v41, %v2464_v52  ;;  %v2581_v44 = vmax.f32 %v2473_v29, 0.0 }
 0x5fa   : > { %v3846_v7 = vpop.f32.mrf.mxu0 }
 0x5fb   : > { %v2476_v6 = vadd.f32 %v3846_v7, %v5122_v41  ;;  %v2579_v16 = vmax.f32 %v2465_v50, 0.0 }
 0x5fc   : > { %v2467_v32 = vpop.f32.mrf.mxu0 }
 0x5fd   : > { %v2468_v54 = vadd.f32 %v5122_v41, %v2467_v32  ;;  %v2582_v1 = vmax.f32 %v2476_v6, 0.0 }
 0x5ff   : > { %v2580_v30 = vmax.f32 %v2468_v54, 0.0  ;;  %v2610_v43 = vpack.c.bf16 %v2582_v1, %v2581_v44 }
 0x601   : > { %v2609_v24 = vpack.c.bf16 %v2580_v30, %v2579_v16 }
 0x603   : > { %3891 = vmatprep.mubr.bf16.mxu0 %v2609_v24 }
 0x604   : > { %3892 = vmatmul.mubr.bf16.gmra.mxu0 %v2610_v43 }
 0x606   : > { %v3849_v39 = vpop.f32.mrf.mxu0 }
 0x607   : > { %v2489_v19 = vadd.f32 %v3849_v39, %v5122_v41 }
 0x608   : > { %v2480_v62 = vpop.f32.mrf.mxu0 }
 0x609   : > { %v2481_v3 = vadd.f32 %v5122_v41, %v2480_v62  ;;  %v2585_v31 = vmax.f32 %v2489_v19, 0.0 }
 0x60a   : > { %v3850_v45 = vpop.f32.mrf.mxu0 }
 0x60b   : > { %v2492_v25 = vadd.f32 %v3850_v45, %v5122_v41  ;;  %v2583_v9 = vmax.f32 %v2481_v3, 0.0 }
 0x60c   : > { %v2483_v63 = vpop.f32.mrf.mxu0 }
 0x60d   : > { %v2484_v48 = vadd.f32 %v5122_v41, %v2483_v63  ;;  %v2586_v37 = vmax.f32 %v2492_v25, 0.0 }
 0x60f   : > { %v2584_v0 = vmax.f32 %v2484_v48, 0.0  ;;  %v2612_v60 = vpack.c.bf16 %v2586_v37, %v2585_v31 }
 0x611   : > { %v2611_v49 = vpack.c.bf16 %v2584_v0, %v2583_v9 }
 0x613   : > { %3895 = vmatprep.mubr.bf16.mxu0 %v2611_v49 }
 0x614   : > { %3896 = vmatmul.mubr.bf16.gmra.mxu0 %v2612_v60 }
 0x616   : > { %v3853_v58 = vpop.f32.mrf.mxu0 }
 0x617   : > { %v2505_v59 = vadd.f32 %v3853_v58, %v5122_v41 }
 0x618   : > { %v2496_v27 = vpop.f32.mrf.mxu0 }
 0x619   : > { %v2497_v14 = vadd.f32 %v5122_v41, %v2496_v27  ;;  %v2589_v8 = vmax.f32 %v2505_v59, 0.0 }
 0x61a   : > { %v3854_v18 = vpop.f32.mrf.mxu0 }
 0x61b   : > { %v2508_v21 = vadd.f32 %v3854_v18, %v5122_v41  ;;  %v2587_v15 = vmax.f32 %v2497_v14, 0.0 }
 0x61c   : > { %v2499_v17 = vpop.f32.mrf.mxu0 }
 0x61d   : > { %v2500_v61 = vadd.f32 %v5122_v41, %v2499_v17  ;;  %v2590_v13 = vmax.f32 %v2508_v21, 0.0 }
 0x61f   : > { %v2588_v26 = vmax.f32 %v2500_v61, 0.0  ;;  %v2614_v55 = vpack.c.bf16 %v2590_v13, %v2589_v8  ;;  %v5159_v61 = vld [vmem:[%s5502_s12] ss:$0 sm:$0xff] }
 0x621   : > { %v2613_v20 = vpack.c.bf16 %v2588_v26, %v2587_v15 }
 0x623   : > { %3899 = vmatprep.mubr.bf16.mxu0 %v2613_v20 }
 0x624   : > { %3900 = vmatmul.mubr.bf16.gmra.mxu0 %v2614_v55 }
 0x626   : > { %v3857_v47 = vpop.f32.mrf.mxu0 }
 0x627   : > { %v2521_v11 = vadd.f32 %v3857_v47, %v5122_v41 }
 0x628   : > { %v2512_v10 = vpop.f32.mrf.mxu0 }
 0x629   : > { %v2513_v56 = vadd.f32 %v5122_v41, %v2512_v10  ;;  %v2593_v5 = vmax.f32 %v2521_v11, 0.0 }
 0x62a   : > { %v3858_v28 = vpop.f32.mrf.mxu0 }
 0x62b   : > { %v2524_v46 = vadd.f32 %v3858_v28, %v5122_v41  ;;  %v2591_v36 = vmax.f32 %v2513_v56, 0.0 }
 0x62c   : > { %v2515_v57 = vpop.f32.mrf.mxu0 }
 0x62d   : > { %v2516_v23 = vadd.f32 %v5122_v41, %v2515_v57  ;;  %v2594_v2 = vmax.f32 %v2524_v46, 0.0 }
 0x62f   : > { %v2592_v12 = vmax.f32 %v2516_v23, 0.0  ;;  %v2616_v22 = vpack.c.bf16 %v2594_v2, %v2593_v5 }
 0x631   : > { %v2615_v53 = vpack.c.bf16 %v2592_v12, %v2591_v36 }
 0x633   : > { %3903 = vmatprep.mubr.bf16.mxu0 %v2615_v53 }
 0x634   : > { %3904 = vmatmul.mubr.bf16.gmra.mxu0 %v2616_v22 }
 0x636   : > { %v3861_v33 = vpop.f32.mrf.mxu0 }
 0x637   : > { %v2537_v38 = vadd.f32 %v3861_v33, %v5122_v41 }
 0x638   : > { %v2528_v4 = vpop.f32.mrf.mxu0 }
 0x639   : > { %v2529_v40 = vadd.f32 %v5122_v41, %v2528_v4  ;;  %v2597_v6 = vmax.f32 %v2537_v38, 0.0 }
 0x63a   : > { %v3862_v42 = vpop.f32.mrf.mxu0 }
 0x63b   : > { %v2540_v34 = vadd.f32 %v3862_v42, %v5122_v41  ;;  %v2595_v7 = vmax.f32 %v2529_v40, 0.0 }
 0x63c   : > { %v2531_v51 = vpop.f32.mrf.mxu0 }
 0x63d   : > { %v2532_v35 = vadd.f32 %v5122_v41, %v2531_v51  ;;  %v2598_v52 = vmax.f32 %v2540_v34, 0.0 }
 0x63f   : > { %v2596_v50 = vmax.f32 %v2532_v35, 0.0  ;;  %v2618_v32 = vpack.c.bf16 %v2598_v52, %v2597_v6 }
 0x641   : > { %v2617_v29 = vpack.c.bf16 %v2596_v50, %v2595_v7 }
 0x643   : > { %3907 = vmatprep.mubr.bf16.mxu0 %v2617_v29 }
 0x644   : > { %3908 = vmatmul.mubr.bf16.gmra.mxu0 %v2618_v32 }
 0x646   : > { %v3865_v54 = vpop.f32.mrf.mxu0 }
 0x647   : > { %v2553_v24 = vadd.f32 %v3865_v54, %v5122_v41 }
 0x648   : > { %v2544_v1 = vpop.f32.mrf.mxu0 }
 0x649   : > { %v2545_v30 = vadd.f32 %v5122_v41, %v2544_v1  ;;  %v2601_v25 = vmax.f32 %v2553_v24, 0.0 }
 0x64a   : > { %v3866_v16 = vpop.f32.mrf.mxu0 }
 0x64b   : > { %v2556_v44 = vadd.f32 %v3866_v16, %v5122_v41  ;;  %v2599_v45 = vmax.f32 %v2545_v30, 0.0 }
 0x64c   : > { %v2547_v43 = vpop.f32.mrf.mxu0 }
 0x64d   : > { %v2548_v39 = vadd.f32 %v5122_v41, %v2547_v43  ;;  %v2602_v62 = vmax.f32 %v2556_v44, 0.0 }
 0x64f   : > { %v2600_v3 = vmax.f32 %v2548_v39, 0.0  ;;  %v2620_v63 = vpack.c.bf16 %v2602_v62, %v2601_v25 }
 0x651   : > { %v2619_v19 = vpack.c.bf16 %v2600_v3, %v2599_v45 }
 0x653   : > { %3911 = vmatprep.mubr.bf16.mxu0 %v2619_v19 }
 0x654   : > { %3912 = vmatmul.mubr.bf16.gmra.mxu0 %v2620_v63 }
 0x656   : > { %v3869_v48 = vpop.f32.mrf.mxu0 }
 0x657   : > { %v2569_v49 = vadd.f32 %v3869_v48, %v5122_v41 }
 0x658   : > { %v2560_v37 = vpop.f32.mrf.mxu0 }
 0x659   : > { %v2561_v0 = vadd.f32 %v5122_v41, %v2560_v37  ;;  %v2605_v21 = vmax.f32 %v2569_v49, 0.0 }
 0x65a   : > { %v3870_v9 = vpop.f32.mrf.mxu0 }
 0x65b   : > { %v2572_v31 = vadd.f32 %v3870_v9, %v5122_v41  ;;  %v2603_v18 = vmax.f32 %v2561_v0, 0.0 }
 0x65c   : > { %v2563_v60 = vpop.f32.mrf.mxu0 }
 0x65d   : > { %v2564_v58 = vadd.f32 %v5122_v41, %v2563_v60  ;;  %v2606_v27 = vmax.f32 %v2572_v31, 0.0 }
 0x65f   : > { %v2604_v14 = vmax.f32 %v2564_v58, 0.0  ;;  %v2622_v17 = vpack.c.bf16 %v2606_v27, %v2605_v21 }
 0x661   : > { %v2621_v59 = vpack.c.bf16 %v2604_v14, %v2603_v18 }
 0x663   : > { %3915 = vmatprep.mubr.bf16.mxu0 %v2621_v59 }
 0x664   : > { %3916 = vmatmul.mubr.bf16.gmra.mxu0 %v2622_v17 }
 0x6b4   : > { %v3889_v13 = vpop.f32.mrf.mxu0 }
 0x6b5   : > { %v5162_v15 = vadd.f32 %v3889_v13, %v5159_v61 }
 0x6b6   : > { %v2728_v26 = vpop.f32.mrf.mxu0 }
 0x6b7   : > { %2859 = vmax.xlane.f32.xlu0 %v5162_v15  ;;  %v5166_v8 = vadd.f32 %v5159_v61, %v2728_v26 }
 0x6b8   : > { %v3890_v41 = vpop.f32.mrf.mxu0 }
 0x6b9   : > { %v5173_v47 = vadd.f32 %v3890_v41, %v5159_v61 }
 0x6ba   : > { %v2731_v20 = vpop.f32.mrf.mxu0 }
 0x6bb   : > { %v5169_v55 = vadd.f32 %v5159_v61, %v2731_v20  ;;  %2855 = vmax.xlane.f32.xlu0 %v5166_v8 }
 0x6bd   : > { %2857 = vmax.xlane.f32.xlu1 %v5169_v55 }
 0x6bf   : > { %2861 = vmax.xlane.f32.xlu0 %v5173_v47 }
 0x6c4   : > { %v3893_v10 = vpop.f32.mrf.mxu0 }
 0x6c5   : > { %v5178_v28 = vadd.f32 %v3893_v10, %v5159_v61 }
 0x6c6   : > { %v2744_v56 = vpop.f32.mrf.mxu0 }
 0x6c7   : > { %2867 = vmax.xlane.f32.xlu1 %v5178_v28  ;;  %v5182_v11 = vadd.f32 %v5159_v61, %v2744_v56 }
 0x6c8   : > { %v3894_v46 = vpop.f32.mrf.mxu0 }
 0x6c9   : > { %v5185_v57 = vadd.f32 %v3894_v46, %v5159_v61 }
 0x6ca   : > { %v2747_v23 = vpop.f32.mrf.mxu0 }
 0x6cb   : > { %2863 = vmax.xlane.f32.xlu1 %v5182_v11  ;;  %2869 = vmax.xlane.f32.xlu0 %v5185_v57  ;;  %v5190_v2 = vadd.f32 %v5159_v61, %v2747_v23 }
 0x6cf   : > { %2865 = vmax.xlane.f32.xlu0 %v5190_v2 }
 0x6d4   : > { %v3897_v36 = vpop.f32.mrf.mxu0 }
 0x6d5   : > { %v5194_v12 = vadd.f32 %v3897_v36, %v5159_v61 }
 0x6d6   : > { %v2760_v5 = vpop.f32.mrf.mxu0 }
 0x6d7   : > { %2875 = vmax.xlane.f32.xlu1 %v5194_v12  ;;  %v5198_v22 = vadd.f32 %v5159_v61, %v2760_v5 }
 0x6d8   : > { %v3898_v53 = vpop.f32.mrf.mxu0 }
 0x6d9   : > { %v5201_v33 = vadd.f32 %v3898_v53, %v5159_v61 }
 0x6da   : > { %v2763_v4 = vpop.f32.mrf.mxu0 }
 0x6db   : > { %2871 = vmax.xlane.f32.xlu1 %v5198_v22  ;;  %2877 = vmax.xlane.f32.xlu0 %v5201_v33  ;;  %v5206_v42 = vadd.f32 %v5159_v61, %v2763_v4 }
 0x6df   : > { %2873 = vmax.xlane.f32.xlu0 %v5206_v42 }
 0x6e4   : > { %v3901_v40 = vpop.f32.mrf.mxu0 }
 0x6e5   : > { %v5210_v34 = vadd.f32 %v3901_v40, %v5159_v61 }
 0x6e6   : > { %v2776_v38 = vpop.f32.mrf.mxu0 }
 0x6e7   : > { %2883 = vmax.xlane.f32.xlu1 %v5210_v34  ;;  %v5214_v35 = vadd.f32 %v5159_v61, %v2776_v38 }
 0x6e8   : > { %v3902_v51 = vpop.f32.mrf.mxu0 }
 0x6e9   : > { %v5217_v52 = vadd.f32 %v3902_v51, %v5159_v61 }
 0x6ea   : > { %v2779_v7 = vpop.f32.mrf.mxu0 }
 0x6eb   : > { %2879 = vmax.xlane.f32.xlu1 %v5214_v35  ;;  %2885 = vmax.xlane.f32.xlu0 %v5217_v52  ;;  %v5222_v50 = vadd.f32 %v5159_v61, %v2779_v7 }
 0x6ef   : > { %2881 = vmax.xlane.f32.xlu0 %v5222_v50 }
 0x6f4   : > { %v3905_v6 = vpop.f32.mrf.mxu0 }
 0x6f5   : > { %v5226_v29 = vadd.f32 %v3905_v6, %v5159_v61 }
 0x6f6   : > { %v2792_v32 = vpop.f32.mrf.mxu0 }
 0x6f7   : > { %2891 = vmax.xlane.f32.xlu1 %v5226_v29  ;;  %v5230_v1 = vadd.f32 %v5159_v61, %v2792_v32 }
 0x6f8   : > { %v3906_v54 = vpop.f32.mrf.mxu0 }
 0x6f9   : > { %v5233_v16 = vadd.f32 %v3906_v54, %v5159_v61 }
 0x6fa   : > { %v2795_v30 = vpop.f32.mrf.mxu0 }
 0x6fb   : > { %2887 = vmax.xlane.f32.xlu1 %v5230_v1  ;;  %2893 = vmax.xlane.f32.xlu0 %v5233_v16  ;;  %v5238_v44 = vadd.f32 %v5159_v61, %v2795_v30 }
 0x6ff   : > { %2889 = vmax.xlane.f32.xlu0 %v5238_v44 }
 0x704   : > { %v3909_v24 = vpop.f32.mrf.mxu0 }
 0x705   : > { %v5242_v43 = vadd.f32 %v3909_v24, %v5159_v61 }
 0x706   : > { %v2808_v39 = vpop.f32.mrf.mxu0 }
 0x707   : > { %2899 = vmax.xlane.f32.xlu1 %v5242_v43  ;;  %v5246_v45 = vadd.f32 %v5159_v61, %v2808_v39 }
 0x708   : > { %v3910_v62 = vpop.f32.mrf.mxu0 }
 0x709   : > { %v5249_v3 = vadd.f32 %v3910_v62, %v5159_v61 }
 0x70a   : > { %v2811_v25 = vpop.f32.mrf.mxu0 }
 0x70b   : > { %2895 = vmax.xlane.f32.xlu1 %v5246_v45  ;;  %2901 = vmax.xlane.f32.xlu0 %v5249_v3  ;;  %v5254_v19 = vadd.f32 %v5159_v61, %v2811_v25 }
 0x70f   : > { %2897 = vmax.xlane.f32.xlu0 %v5254_v19 }
 0x714   : > { %v3913_v63 = vpop.f32.mrf.mxu0 }
 0x715   : > { %v5258_v48 = vadd.f32 %v3913_v63, %v5159_v61 }
 0x716   : > { %v2824_v37 = vpop.f32.mrf.mxu0 }
 0x717   : > { %2907 = vmax.xlane.f32.xlu1 %v5258_v48  ;;  %v5262_v0 = vadd.f32 %v5159_v61, %v2824_v37 }
 0x718   : > { %v3914_v9 = vpop.f32.mrf.mxu0 }
 0x719   : > { %v5265_v31 = vadd.f32 %v3914_v9, %v5159_v61 }
 0x71a   : > { %v2827_v49 = vpop.f32.mrf.mxu0 }
 0x71b   : > { %2903 = vmax.xlane.f32.xlu1 %v5262_v0  ;;  %2909 = vmax.xlane.f32.xlu0 %v5265_v31  ;;  %v5270_v60 = vadd.f32 %v5159_v61, %v2827_v49 }
 0x71f   : > { %2905 = vmax.xlane.f32.xlu0 %v5270_v60 }
 0x724   : > { %v3917_v58 = vpop.f32.mrf.mxu0 }
 0x725   : > { %v5278_v59 = vadd.f32 %v3917_v58, %v5159_v61 }
 0x726   : > { %v2840_v27 = vpop.f32.mrf.mxu0 }
 0x727   : > { %v5274_v18 = vadd.f32 %v5159_v61, %v2840_v27 }
 0x728   : > { %v3918_v14 = vpop.f32.mrf.mxu0 }
 0x729   : > { %2911 = vmax.xlane.f32.xlu1 %v5274_v18  ;;  %v5286_v13 = vadd.f32 %v3918_v14, %v5159_v61 }
 0x72a   : > { %v2843_v21 = vpop.f32.mrf.mxu0 }
 0x72b   : > { %v5281_v17 = vadd.f32 %v5159_v61, %v2843_v21 }
 0x72d   : > { %2915 = vmax.xlane.f32.xlu1 %v5278_v59  ;;  %2913 = vmax.xlane.f32.xlu0 %v5281_v17 }
 0x731   : > { %2917 = vmax.xlane.f32.xlu0 %v5286_v13 }
 0x740   : > { %v2860_v26 = vpop.xlane.xlu0 %2859 }
 0x741   : > { %v2921_v41 = vsub.f32 %v5162_v15, %v2860_v26 }
 0x743   : > { %v2955_v20 = vmul.f32 1.442695, %v2921_v41 }
 0x744   : > { %v2856_v10 = vpop.xlane.xlu0 %2855 }
 0x745   : > { %4050 = vpow2.f32 %v2955_v20  ;;  %v2919_v56 = vsub.f32 %v5166_v8, %v2856_v10 }
 0x746   : > { %v2858_v46 = vpop.xlane.xlu1 %2857 }
 0x747   : > { %v2951_v23 = vmul.f32 1.442695, %v2919_v56  ;;  %v2920_v5 = vsub.f32 %v5169_v55, %v2858_v46 }
 0x748   : > { %v2862_v36 = vpop.xlane.xlu0 %2861 }
 0x749   : > { %4052 = vpow2.f32 %v2951_v23  ;;  %v2922_v53 = vsub.f32 %v5173_v47, %v2862_v36  ;;  %v2953_v4 = vmul.f32 1.442695, %v2920_v5 }
 0x74b   : > { %v2957_v61 = vmul.f32 1.442695, %v2922_v53 }
 0x74d   : > { %4054 = vpow2.f32 %v2957_v61 }
 0x74e   : > { %4056 = vpow2.f32 %v2953_v4 }
 0x750   : > { %v2868_v40 = vpop.xlane.xlu1 %2867 }
 0x751   : > { %v2925_v15 = vsub.f32 %v5178_v28, %v2868_v40 }
 0x752   : > { %v5294_v38 = vpop.eup %4050 }
 0x753   : > { %v2963_v51 = vmul.f32 1.442695, %v2925_v15  ;;  %3019 = vadd.xlane.f32.xlu1 %v5294_v38 }
 0x754   : > { %v2864_v8 = vpop.xlane.xlu1 %2863  ;;  %v2870_v7 = vpop.xlane.xlu0 %2869 }
 0x755   : > { %4058 = vpow2.f32 %v2963_v51  ;;  %v2923_v6 = vsub.f32 %v5182_v11, %v2864_v8  ;;  %v2926_v55 = vsub.f32 %v5185_v57, %v2870_v7 }
 0x756   : > { %v5299_v47 = vpop.eup %4052 }
 0x757   : > { %v2959_v32 = vmul.f32 1.442695, %v2923_v6  ;;  %v2965_v54 = vmul.f32 1.442695, %v2926_v55  ;;  %3015 = vadd.xlane.f32.xlu1 %v5299_v47 }
 0x758   : > { %v2866_v30 = vpop.xlane.xlu0 %2865 }
 0x759   : > { %4060 = vpow2.f32 %v2959_v32  ;;  %v2924_v28 = vsub.f32 %v5190_v2, %v2866_v30 }
 0x75a   : > { %v5303_v24 = vpop.eup %4054  ;;  %4062 = vpow2.f32 %v2965_v54 }
 0x75b   : > { %v2961_v39 = vmul.f32 1.442695, %v2924_v28  ;;  %3021 = vadd.xlane.f32.xlu0 %v5303_v24  ;;  %v5306_v11 = vpop.eup %4056 }
 0x75d   : > { %4064 = vpow2.f32 %v2961_v39 }
 0x75f   : > { %3017 = vadd.xlane.f32.xlu0 %v5306_v11 }
 0x760   : > { %v2876_v57 = vpop.xlane.xlu1 %2875 }
 0x761   : > { %v2929_v62 = vsub.f32 %v5194_v12, %v2876_v57 }
 0x762   : > { %v5310_v25 = vpop.eup %4058 }
 0x763   : > { %v2971_v63 = vmul.f32 1.442695, %v2929_v62  ;;  %3027 = vadd.xlane.f32.xlu1 %v5310_v25 }
 0x764   : > { %v2872_v2 = vpop.xlane.xlu1 %2871  ;;  %v2878_v37 = vpop.xlane.xlu0 %2877 }
 0x765   : > { %4066 = vpow2.f32 %v2971_v63  ;;  %v2927_v9 = vsub.f32 %v5198_v22, %v2872_v2  ;;  %v2930_v49 = vsub.f32 %v5201_v33, %v2878_v37 }
 0x766   : > { %v5315_v58 = vpop.eup %4060 }
 0x767   : > { %v5317_v27 = vpop.eup %4062  ;;  %v2967_v14 = vmul.f32 1.442695, %v2927_v9  ;;  %v2973_v21 = vmul.f32 1.442695, %v2930_v49  ;;  %3023 = vadd.xlane.f32.xlu1 %v5315_v58 }
 0x768   : > { %3029 = vadd.xlane.f32.xlu0 %v5317_v27  ;;  %v2874_v12 = vpop.xlane.xlu0 %2873 }
 0x769   : > { %4068 = vpow2.f32 %v2967_v14  ;;  %v2928_v26 = vsub.f32 %v5206_v42, %v2874_v12 }
 0x76a   : > { %v5322_v41 = vpop.eup %4064  ;;  %4070 = vpow2.f32 %v2973_v21 }
 0x76b   : > { %v2969_v22 = vmul.f32 1.442695, %v2928_v26 }
 0x76c   : > { %3025 = vadd.xlane.f32.xlu0 %v5322_v41 }
 0x76d   : > { %4072 = vpow2.f32 %v2969_v22 }
 0x770   : > { %v2884_v33 = vpop.xlane.xlu1 %2883 }
 0x771   : > { %v2933_v20 = vsub.f32 %v5210_v34, %v2884_v33 }
 0x772   : > { %v5326_v10 = vpop.eup %4066 }
 0x773   : > { %v2979_v56 = vmul.f32 1.442695, %v2933_v20  ;;  %3035 = vadd.xlane.f32.xlu1 %v5326_v10 }
 0x774   : > { %v2880_v46 = vpop.xlane.xlu1 %2879  ;;  %v2886_v23 = vpop.xlane.xlu0 %2885 }
 0x775   : > { %4074 = vpow2.f32 %v2979_v56  ;;  %v2931_v42 = vsub.f32 %v5214_v35, %v2880_v46  ;;  %v2934_v36 = vsub.f32 %v5217_v52, %v2886_v23 }
 0x776   : > { %v5331_v5 = vpop.eup %4068 }
 0x777   : > { %v5333_v53 = vpop.eup %4070  ;;  %v2975_v61 = vmul.f32 1.442695, %v2931_v42  ;;  %v2981_v4 = vmul.f32 1.442695, %v2934_v36  ;;  %3031 = vadd.xlane.f32.xlu1 %v5331_v5 }
 0x778   : > { %3037 = vadd.xlane.f32.xlu0 %v5333_v53  ;;  %v2882_v34 = vpop.xlane.xlu0 %2881 }
 0x779   : > { %4076 = vpow2.f32 %v2975_v61  ;;  %v2932_v40 = vsub.f32 %v5222_v50, %v2882_v34 }
 0x77a   : > { %v5338_v15 = vpop.eup %4072  ;;  %4078 = vpow2.f32 %v2981_v4 }
 0x77b   : > { %v2977_v35 = vmul.f32 1.442695, %v2932_v40 }
 0x77c   : > { %3033 = vadd.xlane.f32.xlu0 %v5338_v15 }
 0x77d   : > { %4080 = vpow2.f32 %v2977_v35 }
 0x780   : > { %v2892_v52 = vpop.xlane.xlu1 %2891 }
 0x781   : > { %v2937_v51 = vsub.f32 %v5226_v29, %v2892_v52 }
 0x782   : > { %v5342_v8 = vpop.eup %4074 }
 0x783   : > { %v2987_v7 = vmul.f32 1.442695, %v2937_v51  ;;  %3043 = vadd.xlane.f32.xlu1 %v5342_v8 }
 0x784   : > { %v2888_v6 = vpop.xlane.xlu1 %2887  ;;  %v2894_v55 = vpop.xlane.xlu0 %2893 }
 0x785   : > { %4082 = vpow2.f32 %v2987_v7  ;;  %v2935_v50 = vsub.f32 %v5230_v1, %v2888_v6  ;;  %v2938_v32 = vsub.f32 %v5233_v16, %v2894_v55 }
 0x786   : > { %v5347_v54 = vpop.eup %4076 }
 0x787   : > { %v5349_v30 = vpop.eup %4078  ;;  %v2983_v28 = vmul.f32 1.442695, %v2935_v50  ;;  %v2989_v39 = vmul.f32 1.442695, %v2938_v32  ;;  %3039 = vadd.xlane.f32.xlu1 %v5347_v54 }
 0x788   : > { %3045 = vadd.xlane.f32.xlu0 %v5349_v30  ;;  %v2890_v29 = vpop.xlane.xlu0 %2889 }
 0x789   : > { %4084 = vpow2.f32 %v2983_v28  ;;  %v2936_v57 = vsub.f32 %v5238_v44, %v2890_v29 }
 0x78a   : > { %v5354_v62 = vpop.eup %4080  ;;  %4086 = vpow2.f32 %v2989_v39 }
 0x78b   : > { %v2985_v1 = vmul.f32 1.442695, %v2936_v57 }
 0x78c   : > { %3041 = vadd.xlane.f32.xlu0 %v5354_v62 }
 0x78d   : > { %4088 = vpow2.f32 %v2985_v1 }
 0x790   : > { %v2900_v16 = vpop.xlane.xlu1 %2899 }
 0x791   : > { %v2941_v63 = vsub.f32 %v5242_v43, %v2900_v16 }
 0x792   : > { %v5358_v2 = vpop.eup %4082 }
 0x793   : > { %v2995_v37 = vmul.f32 1.442695, %v2941_v63  ;;  %3051 = vadd.xlane.f32.xlu1 %v5358_v2 }
 0x794   : > { %v2896_v9 = vpop.xlane.xlu1 %2895  ;;  %v2902_v49 = vpop.xlane.xlu0 %2901 }
 0x795   : > { %4090 = vpow2.f32 %v2995_v37  ;;  %v2939_v44 = vsub.f32 %v5246_v45, %v2896_v9  ;;  %v2942_v14 = vsub.f32 %v5249_v3, %v2902_v49 }
 0x796   : > { %v5363_v21 = vpop.eup %4084 }
 0x797   : > { %v5365_v12 = vpop.eup %4086  ;;  %v2991_v26 = vmul.f32 1.442695, %v2939_v44  ;;  %v2997_v22 = vmul.f32 1.442695, %v2942_v14  ;;  %3047 = vadd.xlane.f32.xlu1 %v5363_v21 }
 0x798   : > { %3053 = vadd.xlane.f32.xlu0 %v5365_v12  ;;  %v2898_v43 = vpop.xlane.xlu0 %2897 }
 0x799   : > { %4092 = vpow2.f32 %v2991_v26  ;;  %v2940_v33 = vsub.f32 %v5254_v19, %v2898_v43 }
 0x79a   : > { %v5370_v20 = vpop.eup %4088  ;;  %4094 = vpow2.f32 %v2997_v22 }
 0x79b   : > { %v2993_v45 = vmul.f32 1.442695, %v2940_v33 }
 0x79c   : > { %3049 = vadd.xlane.f32.xlu0 %v5370_v20 }
 0x79d   : > { %4096 = vpow2.f32 %v2993_v45 }
 0x7a0   : > { %v2908_v3 = vpop.xlane.xlu1 %2907 }
 0x7a1   : > { %v2945_v56 = vsub.f32 %v5258_v48, %v2908_v3 }
 0x7a2   : > { %v5374_v46 = vpop.eup %4090 }
 0x7a3   : > { %v3003_v23 = vmul.f32 1.442695, %v2945_v56  ;;  %3059 = vadd.xlane.f32.xlu1 %v5374_v46 }
 0x7a4   : > { %v2904_v42 = vpop.xlane.xlu1 %2903  ;;  %v2910_v36 = vpop.xlane.xlu0 %2909 }
 0x7a5   : > { %4098 = vpow2.f32 %v3003_v23  ;;  %v2943_v19 = vsub.f32 %v5262_v0, %v2904_v42  ;;  %v2946_v61 = vsub.f32 %v5265_v31, %v2910_v36 }
 0x7a6   : > { %v5379_v4 = vpop.eup %4092 }
 0x7a7   : > { %v5381_v34 = vpop.eup %4094  ;;  %v2999_v40 = vmul.f32 1.442695, %v2943_v19  ;;  %v3005_v35 = vmul.f32 1.442695, %v2946_v61  ;;  %3055 = vadd.xlane.f32.xlu1 %v5379_v4 }
 0x7a8   : > { %3061 = vadd.xlane.f32.xlu0 %v5381_v34  ;;  %v2906_v48 = vpop.xlane.xlu0 %2905 }
 0x7a9   : > { %4100 = vpow2.f32 %v2999_v40  ;;  %v2944_v52 = vsub.f32 %v5270_v60, %v2906_v48 }
 0x7aa   : > { %v5386_v51 = vpop.eup %4096  ;;  %4102 = vpow2.f32 %v3005_v35 }
 0x7ab   : > { %v3001_v0 = vmul.f32 1.442695, %v2944_v52 }
 0x7ac   : > { %3057 = vadd.xlane.f32.xlu0 %v5386_v51 }
 0x7ad   : > { %4104 = vpow2.f32 %v3001_v0 }
 0x7b2   : > { %v5389_v31 = vpop.eup %4098  ;;  %v2912_v7 = vpop.xlane.xlu1 %2911 }
 0x7b3   : > { %v2947_v6 = vsub.f32 %v5274_v18, %v2912_v7  ;;  %3067 = vadd.xlane.f32.xlu1 %v5389_v31 }
 0x7b5   : > { %v3007_v55 = vmul.f32 1.442695, %v2947_v6 }
 0x7b6   : > { %v5393_v50 = vpop.eup %4100  ;;  %v2916_v32 = vpop.xlane.xlu1 %2915 }
 0x7b7   : > { %v2914_v28 = vpop.xlane.xlu0 %2913  ;;  %v5395_v60 = vpop.eup %4102  ;;  %4106 = vpow2.f32 %v3007_v55  ;;  %v2949_v39 = vsub.f32 %v5278_v59, %v2916_v32  ;;  %3063 = vadd.xlane.f32.xlu1 %v5393_v50 }
 0x7b8   : > { %v2948_v29 = vsub.f32 %v5281_v17, %v2914_v28  ;;  %3069 = vadd.xlane.f32.xlu0 %v5395_v60 }
 0x7b9   : > { %v3011_v57 = vmul.f32 1.442695, %v2949_v39 }
 0x7ba   : > { %v3009_v18 = vmul.f32 1.442695, %v2948_v29  ;;  %v5401_v1 = vpop.eup %4104 }
 0x7bb   : > { %v2918_v16 = vpop.xlane.xlu0 %2917  ;;  %4108 = vpow2.f32 %v3011_v57 }
 0x7bc   : > { %v2950_v63 = vsub.f32 %v5286_v13, %v2918_v16  ;;  %4110 = vpow2.f32 %v3009_v18  ;;  %3065 = vadd.xlane.f32.xlu0 %v5401_v1 }
 0x7be   : > { %v3013_v37 = vmul.f32 1.442695, %v2950_v63 }
 0x7c0   : > { %4112 = vpow2.f32 %v3013_v37 }
 0x7c4   : > { %v5405_v59 = vpop.eup %4106 }
 0x7c5   : > { %3071 = vadd.xlane.f32.xlu1 %v5405_v59 }
 0x7c8   : > { %v5408_v17 = vpop.eup %4108 }
 0x7c9   : > { %v5410_v9 = vpop.eup %4110  ;;  %3075 = vadd.xlane.f32.xlu1 %v5408_v17 }
 0x7ca   : > { %3073 = vadd.xlane.f32.xlu0 %v5410_v9 }
 0x7cd   : > { %v5414_v49 = vpop.eup %4112 }
 0x7ce   : > { %3077 = vadd.xlane.f32.xlu0 %v5414_v49 }
 0x7dc   : > { %v3020_v13 = vpop.xlane.xlu1 %3019 }
 0x7dd   : > { %4114 = vrcp.f32 %v3020_v13 }
 0x7e0   : > { %v3016_v44 = vpop.xlane.xlu1 %3015 }
 0x7e1   : > { %4116 = vrcp.f32 %v3016_v44 }
 0x7e4   : > { %v3022_v14 = vpop.xlane.xlu0 %3021 }
 0x7e5   : > { %4118 = vrcp.f32 %v3022_v14 }
 0x7e8   : > { %v3018_v26 = vpop.xlane.xlu0 %3017 }
 0x7e9   : > { %4120 = vrcp.f32 %v3018_v26 }
 0x7ea   : > { %v4115_v22 = vpop.eup %4114 }
 0x7eb   : > { %v3113_v43 = vmul.f32 %v4115_v22, %v5294_v38 }
 0x7ec   : > { %v3028_v33 = vpop.xlane.xlu1 %3027 }
 0x7ed   : > { %3145 = vst [vmem:[%s5421_s28 + $0x10] sm:$0xff] %v3113_v43  ;;  %4122 = vrcp.f32 %v3028_v33 }
 0x7ee   : > { %v4117_v45 = vpop.eup %4116 }
 0x7ef   : > { %v3111_v3 = vmul.f32 %v4117_v45, %v5299_v47 }
 0x7f0   : > { %v3024_v56 = vpop.xlane.xlu1 %3023 }
 0x7f1   : > { %3143 = vst [vmem:[%s5421_s28] sm:$0xff] %v3111_v3  ;;  %4124 = vrcp.f32 %v3024_v56  ;;  %v3030_v23 = vpop.xlane.xlu0 %3029 }
 0x7f2   : > { %v4119_v42 = vpop.eup %4118  ;;  %4126 = vrcp.f32 %v3030_v23 }
 0x7f3   : > { %v3114_v36 = vmul.f32 %v4119_v42, %v5303_v24 }
 0x7f5   : > { %3146 = vst [vmem:[%s5421_s28 + $0x18] sm:$0xff] %v3114_v36  ;;  %v3026_v19 = vpop.xlane.xlu0 %3025 }
 0x7f6   : > { %v4121_v38 = vpop.eup %4120  ;;  %4128 = vrcp.f32 %v3026_v19 }
 0x7f7   : > { %v3112_v61 = vmul.f32 %v4121_v38, %v5306_v11 }
 0x7f9   : > { %3144 = vst [vmem:[%s5421_s28 + $0x8] sm:$0xff] %v3112_v61 }
 0x7fa   : > { %v4123_v40 = vpop.eup %4122 }
 0x7fb   : > { %v3117_v47 = vmul.f32 %v4123_v40, %v5310_v25 }
 0x7fc   : > { %v3036_v35 = vpop.xlane.xlu1 %3035 }
 0x7fd   : > { %3149 = vst [vmem:[%s5421_s28 + $0x30] sm:$0xff] %v3117_v47  ;;  %4130 = vrcp.f32 %v3036_v35 }
 0x7fe   : > { %v4125_v48 = vpop.eup %4124 }
 0x7ff   : > { %v4127_v52 = vpop.eup %4126  ;;  %v3115_v24 = vmul.f32 %v4125_v48, %v5315_v58 }
 0x800   : > { %v3118_v0 = vmul.f32 %v4127_v52, %v5317_v27  ;;  %v3032_v7 = vpop.xlane.xlu1 %3031 }
 0x801   : > { %3147 = vst [vmem:[%s5421_s28 + $0x20] sm:$0xff] %v3115_v24  ;;  %4132 = vrcp.f32 %v3032_v7  ;;  %v3038_v6 = vpop.xlane.xlu0 %3037 }
 0x802   : > { %3150 = vst [vmem:[%s5421_s28 + $0x38] sm:$0xff] %v3118_v0  ;;  %4134 = vrcp.f32 %v3038_v6 }
 0x803   : > { %v4129_v11 = vpop.eup %4128 }
 0x804   : > { %v3116_v25 = vmul.f32 %v4129_v11, %v5322_v41 }
 0x805   : > { %v3034_v55 = vpop.xlane.xlu0 %3033 }
 0x806   : > { %3148 = vst [vmem:[%s5421_s28 + $0x28] sm:$0xff] %v3116_v25  ;;  %4136 = vrcp.f32 %v3034_v55 }
 0x80a   : > { %v4131_v32 = vpop.eup %4130 }
 0x80b   : > { %v3121_v58 = vmul.f32 %v4131_v32, %v5326_v10 }
 0x80c   : > { %v3044_v28 = vpop.xlane.xlu1 %3043 }
 0x80d   : > { %3153 = vst [vmem:[%s5421_s28 + $0x50] sm:$0xff] %v3121_v58  ;;  %4138 = vrcp.f32 %v3044_v28 }
 0x80e   : > { %v4133_v27 = vpop.eup %4132 }
 0x80f   : > { %v4135_v39 = vpop.eup %4134  ;;  %v3119_v29 = vmul.f32 %v4133_v27, %v5331_v5 }
 0x810   : > { %v3122_v57 = vmul.f32 %v4135_v39, %v5333_v53  ;;  %v3040_v18 = vpop.xlane.xlu1 %3039 }
 0x811   : > { %3151 = vst [vmem:[%s5421_s28 + $0x40] sm:$0xff] %v3119_v29  ;;  %4140 = vrcp.f32 %v3040_v18  ;;  %v3046_v41 = vpop.xlane.xlu0 %3045 }
 0x812   : > { %3154 = vst [vmem:[%s5421_s28 + $0x58] sm:$0xff] %v3122_v57  ;;  %4142 = vrcp.f32 %v3046_v41 }
 0x813   : > { %v4137_v16 = vpop.eup %4136 }
 0x814   : > { %v3120_v10 = vmul.f32 %v4137_v16, %v5338_v15 }
 0x815   : > { %v3042_v63 = vpop.xlane.xlu0 %3041 }
 0x816   : > { %3152 = vst [vmem:[%s5421_s28 + $0x48] sm:$0xff] %v3120_v10  ;;  %4144 = vrcp.f32 %v3042_v63 }
 0x81a   : > { %v4139_v37 = vpop.eup %4138 }
 0x81b   : > { %v3125_v5 = vmul.f32 %v4139_v37, %v5342_v8 }
 0x81c   : > { %v3052_v13 = vpop.xlane.xlu1 %3051 }
 0x81d   : > { %3157 = vst [vmem:[%s5421_s28 + $0x70] sm:$0xff] %v3125_v5  ;;  %4146 = vrcp.f32 %v3052_v13 }
 0x81e   : > { %v4141_v53 = vpop.eup %4140 }
 0x81f   : > { %v4143_v44 = vpop.eup %4142  ;;  %v3123_v14 = vmul.f32 %v4141_v53, %v5347_v54 }
 0x820   : > { %v3126_v26 = vmul.f32 %v4143_v44, %v5349_v30  ;;  %v3048_v22 = vpop.xlane.xlu1 %3047 }
 0x821   : > { %3155 = vst [vmem:[%s5421_s28 + $0x60] sm:$0xff] %v3123_v14  ;;  %4148 = vrcp.f32 %v3048_v22  ;;  %v3054_v15 = vpop.xlane.xlu0 %3053 }
 0x822   : > { %3158 = vst [vmem:[%s5421_s28 + $0x78] sm:$0xff] %v3126_v26  ;;  %4150 = vrcp.f32 %v3054_v15 }
 0x823   : > { %v4145_v43 = vpop.eup %4144 }
 0x824   : > { %v3124_v8 = vmul.f32 %v4145_v43, %v5354_v62 }
 0x825   : > { %v3050_v33 = vpop.xlane.xlu0 %3049 }
 0x826   : > { %3156 = vst [vmem:[%s5421_s28 + $0x68] sm:$0xff] %v3124_v8  ;;  %4152 = vrcp.f32 %v3050_v33 }
 0x82a   : > { %v4147_v45 = vpop.eup %4146 }
 0x82b   : > { %v3129_v54 = vmul.f32 %v4147_v45, %v5358_v2 }
 0x82c   : > { %v3060_v3 = vpop.xlane.xlu1 %3059 }
 0x82d   : > { %3161 = vst [vmem:[%s5421_s28 + $0x90] sm:$0xff] %v3129_v54  ;;  %4154 = vrcp.f32 %v3060_v3 }
 0x82e   : > { %v4149_v30 = vpop.eup %4148 }
 0x82f   : > { %v4151_v56 = vpop.eup %4150  ;;  %v3127_v23 = vmul.f32 %v4149_v30, %v5363_v21 }
 0x830   : > { %v3130_v42 = vmul.f32 %v4151_v56, %v5365_v12  ;;  %v3056_v36 = vpop.xlane.xlu1 %3055 }
 0x831   : > { %3159 = vst [vmem:[%s5421_s28 + $0x80] sm:$0xff] %v3127_v23  ;;  %4156 = vrcp.f32 %v3056_v36  ;;  %v3062_v62 = vpop.xlane.xlu0 %3061 }
 0x832   : > { %3162 = vst [vmem:[%s5421_s28 + $0x98] sm:$0xff] %v3130_v42  ;;  %4158 = vrcp.f32 %v3062_v62 }
 0x833   : > { %v4153_v19 = vpop.eup %4152 }
 0x834   : > { %v3128_v2 = vmul.f32 %v4153_v19, %v5370_v20 }
 0x835   : > { %v3058_v38 = vpop.xlane.xlu0 %3057 }
 0x836   : > { %3160 = vst [vmem:[%s5421_s28 + $0x88] sm:$0xff] %v3128_v2  ;;  %4160 = vrcp.f32 %v3058_v38 }
 0x83a   : > { %v4155_v61 = vpop.eup %4154 }
 0x83b   : > { %v3133_v21 = vmul.f32 %v4155_v61, %v5374_v46 }
 0x83c   : > { %v3068_v40 = vpop.xlane.xlu1 %3067 }
 0x83d   : > { %3165 = vst [vmem:[%s5421_s28 + $0xb0] sm:$0xff] %v3133_v21  ;;  %4162 = vrcp.f32 %v3068_v40 }
 0x83e   : > { %v4157_v12 = vpop.eup %4156 }
 0x83f   : > { %v4159_v47 = vpop.eup %4158  ;;  %v3131_v35 = vmul.f32 %v4157_v12, %v5379_v4 }
 0x840   : > { %v3134_v48 = vmul.f32 %v4159_v47, %v5381_v34  ;;  %v3064_v52 = vpop.xlane.xlu1 %3063 }
 0x841   : > { %3163 = vst [vmem:[%s5421_s28 + $0xa0] sm:$0xff] %v3131_v35  ;;  %4164 = vrcp.f32 %v3064_v52  ;;  %v3070_v20 = vpop.xlane.xlu0 %3069 }
 0x842   : > { %3166 = vst [vmem:[%s5421_s28 + $0xb8] sm:$0xff] %v3134_v48  ;;  %4166 = vrcp.f32 %v3070_v20 }
 0x843   : > { %v4161_v46 = vpop.eup %4160 }
 0x844   : > { %v3132_v24 = vmul.f32 %v4161_v46, %v5386_v51 }
 0x845   : > { %v3066_v0 = vpop.xlane.xlu0 %3065 }
 0x846   : > { %3164 = vst [vmem:[%s5421_s28 + $0xa8] sm:$0xff] %v3132_v24  ;;  %4168 = vrcp.f32 %v3066_v0 }
 0x84a   : > { %v4163_v7 = vpop.eup %4162 }
 0x84b   : > { %v3137_v6 = vmul.f32 %v4163_v7, %v5389_v31 }
 0x84d   : > { %3169 = vst [vmem:[%s5421_s28 + $0xd0] sm:$0xff] %v3137_v6 }
 0x84e   : > { %v4165_v4 = vpop.eup %4164  ;;  %v3072_v34 = vpop.xlane.xlu1 %3071 }
 0x84f   : > { %v4167_v11 = vpop.eup %4166  ;;  %v3135_v25 = vmul.f32 %v4165_v4, %v5393_v50  ;;  %4170 = vrcp.f32 %v3072_v34 }
 0x850   : > { %v3138_v55 = vmul.f32 %v4167_v11, %v5395_v60 }
 0x851   : > { %3167 = vst [vmem:[%s5421_s28 + $0xc0] sm:$0xff] %v3135_v25 }
 0x852   : > { %3170 = vst [vmem:[%s5421_s28 + $0xd8] sm:$0xff] %v3138_v55  ;;  %v3076_v51 = vpop.xlane.xlu1 %3075 }
 0x853   : > { %v4169_v32 = vpop.eup %4168  ;;  %4172 = vrcp.f32 %v3076_v51  ;;  %v3074_v58 = vpop.xlane.xlu0 %3073 }
 0x854   : > { %v3136_v31 = vmul.f32 %v4169_v32, %v5401_v1  ;;  %4174 = vrcp.f32 %v3074_v58 }
 0x856   : > { %3168 = vst [vmem:[%s5421_s28 + $0xc8] sm:$0xff] %v3136_v31 }
 0x857   : > { %v3078_v28 = vpop.xlane.xlu0 %3077 }
 0x858   : > { %4176 = vrcp.f32 %v3078_v28 }
 0x85c   : > { %v4171_v50 = vpop.eup %4170 }
 0x85d   : > { %v3139_v27 = vmul.f32 %v4171_v50, %v5405_v59 }
 0x85f   : > { %3171 = vst [vmem:[%s5421_s28 + $0xe0] sm:$0xff] %v3139_v27 }
 0x860   : > { %v4173_v60 = vpop.eup %4172 }
 0x861   : > { %v4175_v39 = vpop.eup %4174  ;;  %v3141_v29 = vmul.f32 %v4173_v60, %v5408_v17 }
 0x862   : > { %v3140_v57 = vmul.f32 %v4175_v39, %v5410_v9 }
 0x863   : > { %3173 = vst [vmem:[%s5421_s28 + $0xf0] sm:$0xff] %v3141_v29 }
 0x864   : > { %3172 = vst [vmem:[%s5421_s28 + $0xe8] sm:$0xff] %v3140_v57 }
 0x865   : > { %v4177_v18 = vpop.eup %4176 }
 0x866   : > { %v3142_v1 = vmul.f32 %v4177_v18, %v5414_v49 }
 0x868   : > { %3174 = vst [vmem:[%s5421_s28 + $0xf8] sm:$0xff] %v3142_v1 }
 0x869 PF: > { %s23_s25 = sadd.s32 1, %s4184_s25  }
 0x86a   : > { %p20_p4 = scmp.ge.s32.totalorder %s23_s25, 6  }
 0x86c   :  { %22 = sbr.rel (!%p20_p4) target bundleno = 1 (0x1), region = 102 }

</bundles_post_ra>
